<compile_context>
chip_gen: v6e
topology: v6e:2x2x1
jax: 0.10.0
libtpu: 0.0.40
codegen_flags: <defaults>
</compile_context>

<pallas_src>
import jax
import jax.numpy as jnp
from jax.experimental import pallas as pl
from jax.experimental.pallas import tpu as pltpu

NEG_SLOPE = 0.2
_MASK_BIG = 1e30


def _pick_tile(n, max_tile=512):
    """Largest tile that satisfies the (8,128) block constraints and divides n."""
    if n <= max_tile:
        return n
    for t in (512, 256, 128):
        if n % t == 0:
            return t
    # TODO(synk): pad ragged graphs (N not a multiple of 128) instead of raising.
    raise ValueError(f"N={n} must be <= {max_tile} or a multiple of 128")


def _proj_kernel(x_ref, w_ref, o_ref):
    """Fused projection: one lane-dense matmul for all heads + attention dots."""
    o_ref[...] = jnp.dot(x_ref[...], w_ref[...],
                         preferred_element_type=jnp.float32)


def _gat_attn_kernel(feat_ref, elt_ref, er_ref, adj_ref, out_ref,
                     m_sc, l_sc, acc_sc):
    """Online-softmax edge attention + aggregation for one (dst, src) tile pair.

    feat_ref : (Ts, H*D)  projected source features (all heads, fused lanes)
    elt_ref  : (H, Ts)    el (source term), lane-oriented
    er_ref   : (Td, H)    er (destination term)
    adj_ref  : (Td, Ts)   int8 adjacency mask
    out_ref  : (Td, H*D)  lane-dense output slab
    scratch  : m_sc/l_sc (H, Td, 1) running max/sum, acc_sc (Td, H*D) accumulator
    """
    H = elt_ref.shape[0]
    t_src, HD = feat_ref.shape
    t_dst = adj_ref.shape[0]
    D = HD // H
    s = pl.program_id(1)

    @pl.when(s == 0)
    def _():
        m_sc[...] = jnp.full_like(m_sc, -_MASK_BIG)
        l_sc[...] = jnp.zeros_like(l_sc)
        acc_sc[...] = jnp.zeros_like(acc_sc)

    adj = adj_ref[...].astype(jnp.float32)                  # (Td, Ts) in {0,1}
    neg = (adj - 1.0) * _MASK_BIG                           # additive -inf-ish mask
    feat = feat_ref[...]                                    # (Ts, H*D)

    # Lane index over the fused H*D axis -> per-head column masks.
    lane_src = jax.lax.broadcasted_iota(jnp.int32, (t_src, HD), 1)
    lane_dst = jax.lax.broadcasted_iota(jnp.int32, (t_dst, HD), 1)

    alpha_full = jnp.ones((t_dst, HD), jnp.float32)         # per-column rescale
    upd_full = jnp.zeros((t_dst, HD), jnp.float32)          # this tile's contribution

    for h in range(H):                                      # static unroll over heads
        lo, hi = h * D, (h + 1) * D
        er_h = er_ref[:, h:h + 1]                           # (Td, 1)
        el_h = elt_ref[h:h + 1, :]                          # (1, Ts) lane oriented
        e = er_h + el_h                                     # u_add_v -> (Td, Ts)
        e = jnp.where(e > 0, e, NEG_SLOPE * e) + neg        # LeakyReLU + mask

        m_prev = m_sc[h]                                    # (Td, 1)
        m_new = jnp.maximum(m_prev, jnp.max(e, axis=-1, keepdims=True))
        alpha = jnp.exp(m_prev - m_new)                     # (Td, 1)
        p = jnp.exp(e - m_new) * adj                        # exact zeros off-graph
        l_sc[h] = alpha * l_sc[h] + jnp.sum(p, axis=-1, keepdims=True)
        m_sc[h] = m_new

        # Zero all columns except head h's, then do a full H*D-wide matmul:
        # same MXU passes as a D-wide one, but output stays lane-dense.
        feat_h = jnp.where((lane_src >= lo) & (lane_src < hi), feat, 0.0)
        upd_full = upd_full + jnp.dot(p.astype(feat.dtype), feat_h,
                                      preferred_element_type=jnp.float32)
        alpha_full = jnp.where((lane_dst >= lo) & (lane_dst < hi),
                               alpha, alpha_full)

    acc_sc[...] = alpha_full * acc_sc[...] + upd_full       # one full-width RMW

    @pl.when(s == pl.num_programs(1) - 1)
    def _():
        # Deferred normalization: O(N*H) reciprocals instead of O(N^2) divides.
        inv_full = jnp.zeros((t_dst, HD), jnp.float32)
        for h in range(H):
            lo, hi = h * D, (h + 1) * D
            l = jnp.maximum(l_sc[h], 1e-38)                 # 0-in-degree -> output 0
            inv = pl.reciprocal(l, approx=True)             # EUP slot
            inv = inv * (2.0 - l * inv)                     # 1 Newton step -> ~exact
            inv_full = jnp.where((lane_dst >= lo) & (lane_dst < hi),
                                 inv, inv_full)
        out_ref[...] = (acc_sc[...] * inv_full).astype(out_ref.dtype)


def gat_conv(x, w_heads, attn_l, attn_r, adj, *, matmul_dtype=jnp.float32):
    """Forward of GATConv at module defaults. Returns (N, H, D).

    matmul_dtype: set to jnp.bfloat16 on v6e/v7x for ~2x MXU throughput
    (f32 accumulation is kept); leave f32 to match PyTorch numerics exactly.
    """
    N, Fin = x.shape
    H, _, D = w_heads.shape
    HD = H * D

    # Fused projection matrix [W_all | W @ attn_l | W @ attn_r], lane-padded.
    w_all = jnp.transpose(w_heads, (1, 0, 2)).reshape(Fin, HD)     # (Fin, H*D)
    wal = jnp.einsum('hfd,hd->fh', w_heads, attn_l[:, 0, :])       # (Fin, H)
    war = jnp.einsum('hfd,hd->fh', w_heads, attn_r[:, 0, :])       # (Fin, H)
    w_ext = jnp.concatenate([w_all, wal, war], axis=1)             # (Fin, H*D+2H)
    fc = HD + 2 * H
    fc_pad = ((fc + 127) // 128) * 128                             # lane-dense output
    w_ext = jnp.pad(w_ext, ((0, 0), (0, fc_pad - fc))).astype(matmul_dtype)
    x_mm = x.astype(matmul_dtype)

    t_row = _pick_tile(N)
    proj = pl.pallas_call(
        _proj_kernel,
        out_shape=jax.ShapeDtypeStruct((N, fc_pad), jnp.float32),
        grid_spec=pltpu.PrefetchScalarGridSpec(
            num_scalar_prefetch=0,
            grid=(N // t_row,),
            in_specs=[pl.BlockSpec((t_row, Fin), lambda r: (r, 0)),
                      pl.BlockSpec((Fin, fc_pad), lambda r: (0, 0))],
            out_specs=pl.BlockSpec((t_row, fc_pad), lambda r: (r, 0))),
        compiler_params=pltpu.CompilerParams(
            dimension_semantics=("parallel",),
            vmem_limit_bytes=32 * 1024 * 1024),
    )(x_mm, w_ext)

    feat = proj[:, :HD].astype(matmul_dtype)          # (N, H*D) projected features
    el_t = proj[:, HD:HD + H].T                       # (H, N) source term, lane axis = src
    er = proj[:, HD + H:fc]                           # (N, H) destination term

    adj_i8 = adj.astype(jnp.int8)                     # 4x less HBM/VMEM than f32

    t_dst = _pick_tile(N)
    t_src = _pick_tile(N)
    out_flat = pl.pallas_call(
        _gat_attn_kernel,
        out_shape=jax.ShapeDtypeStruct((N, HD), jnp.float32),
        grid_spec=pltpu.PrefetchScalarGridSpec(
            num_scalar_prefetch=0,
            grid=(N // t_dst, N // t_src),            # src (reduction) axis last
            in_specs=[
                pl.BlockSpec((t_src, HD), lambda d, s: (s, 0)),      # feat_src
                pl.BlockSpec((H, t_src), lambda d, s: (0, s)),       # el (lane oriented)
                pl.BlockSpec((t_dst, H), lambda d, s: (d, 0)),       # er
                pl.BlockSpec((t_dst, t_src), lambda d, s: (d, s)),   # adj int8
            ],
            out_specs=pl.BlockSpec((t_dst, HD), lambda d, s: (d, 0)),
            scratch_shapes=[
                pltpu.VMEM((H, t_dst, 1), jnp.float32),   # running max m
                pltpu.VMEM((H, t_dst, 1), jnp.float32),   # running sum l
                pltpu.VMEM((t_dst, HD), jnp.float32),     # output accumulator
            ]),
        compiler_params=pltpu.CompilerParams(
            dimension_semantics=("parallel", "arbitrary"),
            vmem_limit_bytes=32 * 1024 * 1024),
    )(feat, el_t, er, adj_i8)

    # TODO(synk): feat_drop/attn_drop, residual branch and activation are identity
    # at the module defaults and are not implemented in-kernel.
    return out_flat.reshape(N, H, D)


def gat_ref(x, w_heads, attn_l, attn_r, adj):
    """Pure-JAX reference mirroring the PyTorch/DGL forward (f32, highest precision)."""
    hp = jax.lax.Precision.HIGHEST
    feat = jnp.einsum('nf,hfd->nhd', x, w_heads, precision=hp)      # (N, H, D)
    el = jnp.einsum('nhd,hd->nh', feat, attn_l[:, 0, :], precision=hp)
    er = jnp.einsum('nhd,hd->nh', feat, attn_r[:, 0, :], precision=hp)
    e = er[:, None, :] + el[None, :, :]                             # (Ndst, Nsrc, H)
    e = jnp.where(e > 0, e, NEG_SLOPE * e)
    mask = (adj > 0)[:, :, None]
    e = jnp.where(mask, e, -_MASK_BIG)
    e = e - jnp.max(e, axis=1, keepdims=True)
    p = jnp.where(mask, jnp.exp(e), 0.0)
    a = p / jnp.sum(p, axis=1, keepdims=True)
    return jnp.einsum('vuh,uhd->vhd', a, feat, precision=hp)        # (N, H, D)


if __name__ == "__main__":
    # Small shapes consistent with the module: N nodes, in_feats, out_feats, heads.
    N, Fin, D, H = 16, 32, 16, 4

    key = jax.random.PRNGKey(0)
    k_x, k_w, k_al, k_ar, k_adj = jax.random.split(key, 5)

    # Deterministic "xavier_normal_(gain=calculate_gain('relu'))"-style init.
    gain = jnp.sqrt(2.0)
    std_fc = gain * jnp.sqrt(2.0 / (Fin + H * D))
    w_heads = std_fc * jax.random.normal(k_w, (H, Fin, D), dtype=jnp.float32)
    std_attn = gain * jnp.sqrt(2.0 / (H + D))
    attn_l = std_attn * jax.random.normal(k_al, (H, 1, D), dtype=jnp.float32)
    attn_r = std_attn * jax.random.normal(k_ar, (H, 1, D), dtype=jnp.float32)
    x = jax.random.normal(k_x, (N, Fin), dtype=jnp.float32)

    # Random sparse-ish graph + self-loops (in_degree > 0, as DGL requires).
    adj_bool = (jax.random.uniform(k_adj, (N, N)) < 0.3) | jnp.eye(N, dtype=bool)
    adj = adj_bool.astype(jnp.int8)                 # adj[dst, src]

    out = jax.block_until_ready(jax.jit(gat_conv)(x, w_heads, attn_l, attn_r, adj))
    ref = gat_ref(x, w_heads, attn_l, attn_r, adj.astype(jnp.float32))

    assert out.shape == (N, H, D), out.shape
    max_err = float(jnp.max(jnp.abs(out - ref)))
    assert jnp.allclose(out, ref, rtol=1e-3, atol=1e-3), max_err

    print("KERNEL_OK")
</pallas_src>

<mosaic_0001>
module attributes {stable_mosaic.version = 11 : i64} {
  func.func @_proj_kernel(%arg0: i32, %arg1: memref<16x32xf32, #tpu.memory_space<vmem>>, %arg2: memref<32x128xf32, #tpu.memory_space<vmem>>, %arg3: memref<16x128xf32, #tpu.memory_space<vmem>>) attributes {dimension_semantics = [#tpu.dimension_semantics<parallel>], iteration_bounds = array<i64: 1>, scalar_prefetch = 0 : i64, scratch_operands = 0 : i64, tpu.core_type = #tpu.core_type<tc>, window_params = [{transform_indices = @transform_0, window_bounds = array<i64: 16, 32>}, {pipeline_mode = #tpu.pipeline_mode<synchronous>, transform_indices = @transform_1, window_bounds = array<i64: 32, 128>}, {transform_indices = @transform_2, window_bounds = array<i64: 16, 128>}]} {
    %c0 = arith.constant 0 : index
    %c0_0 = arith.constant 0 : index
    %0 = vector.load %arg1[%c0, %c0_0] : memref<16x32xf32, #tpu.memory_space<vmem>>, vector<16x32xf32>
    %c0_1 = arith.constant 0 : index
    %c0_2 = arith.constant 0 : index
    %1 = vector.load %arg2[%c0_1, %c0_2] : memref<32x128xf32, #tpu.memory_space<vmem>>, vector<32x128xf32>
    %cst = arith.constant dense<0.000000e+00> : vector<16x128xf32>
    %2 = tpu.matmul %0, %1, %cst {dimension_numbers = #tpu.dot_dimension_numbers<[1], [0], [0], [1], [0, 0, 1, 1], [], []>} : vector<16x32xf32>, vector<32x128xf32>, vector<16x128xf32> -> vector<16x128xf32>
    %c0_3 = arith.constant 0 : index
    %c0_4 = arith.constant 0 : index
    %3 = vector.load %arg3[%c0_3, %c0_4] : memref<16x128xf32, #tpu.memory_space<vmem>>, vector<16x128xf32>
    tpu.vector_store %arg3[%c0_3, %c0_4], %2 {strides = array<i32>} : memref<16x128xf32, #tpu.memory_space<vmem>>, vector<16x128xf32>,
    return
  }
  func.func @transform_0(%arg0: i32) -> (i32, i32) {
    %c0_i32 = arith.constant 0 : i32
    %c0_i32_0 = arith.constant 0 : i32
    return %arg0, %c0_i32 : i32, i32
  }
  func.func @transform_1(%arg0: i32) -> (i32, i32) {
    %c0_i32 = arith.constant 0 : i32
    %c0_i32_0 = arith.constant 0 : i32
    %c0_i32_1 = arith.constant 0 : i32
    return %c0_i32, %c0_i32_0 : i32, i32
  }
  func.func @transform_2(%arg0: i32) -> (i32, i32) {
    %c0_i32 = arith.constant 0 : i32
    %c0_i32_0 = arith.constant 0 : i32
    return %arg0, %c0_i32 : i32, i32
  }
}

module attributes {stable_mosaic.version = 11 : i64} {
  func.func @_gat_attn_kernel(%arg0: i32, %arg1: i32, %arg2: memref<16x64xf32, #tpu.memory_space<vmem>>, %arg3: memref<4x16xf32, #tpu.memory_space<vmem>>, %arg4: memref<16x4xf32, #tpu.memory_space<vmem>>, %arg5: memref<16x16xi8, #tpu.memory_space<vmem>>, %arg6: memref<16x64xf32, #tpu.memory_space<vmem>>, %arg7: memref<4x16x1xf32, #tpu.memory_space<vmem>>, %arg8: memref<4x16x1xf32, #tpu.memory_space<vmem>>, %arg9: memref<16x64xf32, #tpu.memory_space<vmem>>) attributes {dimension_semantics = [#tpu.dimension_semantics<parallel>, #tpu.dimension_semantics<arbitrary>], iteration_bounds = array<i64: 1, 1>, scalar_prefetch = 0 : i64, scratch_operands = 3 : i64, tpu.core_type = #tpu.core_type<tc>, window_params = [{transform_indices = @transform_0, window_bounds = array<i64: 16, 64>}, {transform_indices = @transform_1, window_bounds = array<i64: 4, 16>}, {transform_indices = @transform_2, window_bounds = array<i64: 16, 4>}, {transform_indices = @transform_3, window_bounds = array<i64: 16, 16>}, {transform_indices = @transform_4, window_bounds = array<i64: 16, 64>}]} {
    %c0_i32 = arith.constant 0 : i32
    %0 = arith.cmpi eq, %arg1, %c0_i32 : i32
    %1 = arith.extui %0 : i1 to i32
    %c0_i32_0 = arith.constant 0 : i32
    %2 = arith.cmpi ne, %1, %c0_i32_0 : i32
    scf.if %2 {
      %cst_110 = arith.constant -1.000000e+30 : f32
      %225 = vector.broadcast %cst_110 : f32 to vector<4x16x1xf32>
      %c0_111 = arith.constant 0 : index
      %c0_112 = arith.constant 0 : index
      %c0_113 = arith.constant 0 : index
      %226 = vector.load %arg7[%c0_111, %c0_112, %c0_113] : memref<4x16x1xf32, #tpu.memory_space<vmem>>, vector<4x16x1xf32>
      tpu.vector_store %arg7[%c0_111, %c0_112, %c0_113], %225 {strides = array<i32>} : memref<4x16x1xf32, #tpu.memory_space<vmem>>, vector<4x16x1xf32>,
      %cst_114 = arith.constant 0.000000e+00 : f32
      %227 = vector.broadcast %cst_114 : f32 to vector<4x16x1xf32>
      %c0_115 = arith.constant 0 : index
      %c0_116 = arith.constant 0 : index
      %c0_117 = arith.constant 0 : index
      %228 = vector.load %arg8[%c0_115, %c0_116, %c0_117] : memref<4x16x1xf32, #tpu.memory_space<vmem>>, vector<4x16x1xf32>
      tpu.vector_store %arg8[%c0_115, %c0_116, %c0_117], %227 {strides = array<i32>} : memref<4x16x1xf32, #tpu.memory_space<vmem>>, vector<4x16x1xf32>,
      %cst_118 = arith.constant 0.000000e+00 : f32
      %229 = vector.broadcast %cst_118 : f32 to vector<16x64xf32>
      %c0_119 = arith.constant 0 : index
      %c0_120 = arith.constant 0 : index
      %230 = vector.load %arg9[%c0_119, %c0_120] : memref<16x64xf32, #tpu.memory_space<vmem>>, vector<16x64xf32>
      tpu.vector_store %arg9[%c0_119, %c0_120], %229 {strides = array<i32>} : memref<16x64xf32, #tpu.memory_space<vmem>>, vector<16x64xf32>,
    } else {
    }
    %c0 = arith.constant 0 : index
    %c0_1 = arith.constant 0 : index
    %3 = vector.load %arg5[%c0, %c0_1] : memref<16x16xi8, #tpu.memory_space<vmem>>, vector<16x16xi8>
    %4 = arith.sitofp %3 : vector<16x16xi8> to vector<16x16xf32>
    %cst = arith.constant 1.000000e+00 : f32
    %5 = vector.broadcast %cst : f32 to vector<16x16xf32>
    %6 = arith.subf %4, %5 : vector<16x16xf32>
    %cst_2 = arith.constant 1.000000e+30 : f32
    %7 = vector.broadcast %cst_2 : f32 to vector<16x16xf32>
    %8 = arith.mulf %6, %7 : vector<16x16xf32>
    %c0_3 = arith.constant 0 : index
    %c0_4 = arith.constant 0 : index
    %9 = vector.load %arg2[%c0_3, %c0_4] : memref<16x64xf32, #tpu.memory_space<vmem>>, vector<16x64xf32>
    %10 = tpu.iota {dimensions = array<i32: 1>} : vector<16x64xi32>
    %11 = tpu.iota {dimensions = array<i32: 1>} : vector<16x64xi32>
    %cst_5 = arith.constant 1.000000e+00 : f32
    %12 = vector.broadcast %cst_5 : f32 to vector<16x64xf32>
    %cst_6 = arith.constant 0.000000e+00 : f32
    %13 = vector.broadcast %cst_6 : f32 to vector<16x64xf32>
    %c0_7 = arith.constant 0 : index
    %c0_8 = arith.constant 0 : index
    %14 = vector.load %arg4[%c0_7, %c0_8] : memref<16x4xf32, #tpu.memory_space<vmem>>, vector<16x1xf32>
    %c0_9 = arith.constant 0 : index
    %c0_10 = arith.constant 0 : index
    %15 = vector.load %arg3[%c0_9, %c0_10] : memref<4x16xf32, #tpu.memory_space<vmem>>, vector<1x16xf32>
    %16 = vector.broadcast %14 : vector<16x1xf32> to vector<16x16xf32>
    %17 = vector.broadcast %15 : vector<1x16xf32> to vector<16x16xf32>
    %18 = arith.addf %16, %17 : vector<16x16xf32>
    %cst_11 = arith.constant 0.000000e+00 : f32
    %19 = vector.broadcast %cst_11 : f32 to vector<16x16xf32>
    %20 = arith.cmpf ogt, %18, %19 : vector<16x16xf32>
    %cst_12 = arith.constant 2.000000e-01 : f32
    %21 = vector.broadcast %cst_12 : f32 to vector<16x16xf32>
    %22 = arith.mulf %21, %18 : vector<16x16xf32>
    %23 = arith.select %20, %18, %22 : vector<16x16xi1>, vector<16x16xf32>
    %24 = arith.addf %23, %8 : vector<16x16xf32>
    %c0_13 = arith.constant 0 : index
    %c0_14 = arith.constant 0 : index
    %c0_15 = arith.constant 0 : index
    %25 = vector.load %arg7[%c0_13, %c0_14, %c0_15] : memref<4x16x1xf32, #tpu.memory_space<vmem>>, vector<1x16x1xf32>
    %26 = vector.shape_cast %25 : vector<1x16x1xf32> to vector<16x1xf32>
    %cst_16 = arith.constant dense<0xFF800000> : vector<16xf32>
    %27 = vector.multi_reduction <maximumf>, %24, %cst_16 [1] : vector<16x16xf32> to vector<16xf32>
    %28 = vector.shape_cast %27 : vector<16xf32> to vector<16x1xf32>
    %29 = arith.maximumf %26, %28 : vector<16x1xf32>
    %30 = arith.subf %26, %29 : vector<16x1xf32>
    %31 = math.exp %30 : vector<16x1xf32>
    %32 = vector.broadcast %29 : vector<16x1xf32> to vector<16x16xf32>
    %33 = arith.subf %24, %32 : vector<16x16xf32>
    %34 = math.exp %33 : vector<16x16xf32>
    %35 = arith.mulf %34, %4 : vector<16x16xf32>
    %c0_17 = arith.constant 0 : index
    %c0_18 = arith.constant 0 : index
    %c0_19 = arith.constant 0 : index
    %36 = vector.load %arg8[%c0_17, %c0_18, %c0_19] : memref<4x16x1xf32, #tpu.memory_space<vmem>>, vector<1x16x1xf32>
    %37 = vector.shape_cast %36 : vector<1x16x1xf32> to vector<16x1xf32>
    %38 = arith.mulf %31, %37 : vector<16x1xf32>
    %cst_20 = arith.constant dense<0.000000e+00> : vector<16xf32>
    %39 = vector.multi_reduction <add>, %35, %cst_20 [1] : vector<16x16xf32> to vector<16xf32>
    %40 = vector.shape_cast %39 : vector<16xf32> to vector<16x1xf32>
    %41 = arith.addf %38, %40 : vector<16x1xf32>
    %c0_21 = arith.constant 0 : index
    %c0_22 = arith.constant 0 : index
    %c0_23 = arith.constant 0 : index
    %42 = vector.load %arg8[%c0_21, %c0_22, %c0_23] : memref<4x16x1xf32, #tpu.memory_space<vmem>>, vector<1x16x1xf32>
    %43 = vector.shape_cast %42 : vector<1x16x1xf32> to vector<16x1xf32>
    %44 = vector.shape_cast %41 : vector<16x1xf32> to vector<1x16x1xf32>
    tpu.vector_store %arg8[%c0_21, %c0_22, %c0_23], %44 {strides = array<i32>} : memref<4x16x1xf32, #tpu.memory_space<vmem>>, vector<1x16x1xf32>,
    %c0_24 = arith.constant 0 : index
    %c0_25 = arith.constant 0 : index
    %c0_26 = arith.constant 0 : index
    %45 = vector.load %arg7[%c0_24, %c0_25, %c0_26] : memref<4x16x1xf32, #tpu.memory_space<vmem>>, vector<1x16x1xf32>
    %46 = vector.shape_cast %45 : vector<1x16x1xf32> to vector<16x1xf32>
    %47 = vector.shape_cast %29 : vector<16x1xf32> to vector<1x16x1xf32>
    tpu.vector_store %arg7[%c0_24, %c0_25, %c0_26], %47 {strides = array<i32>} : memref<4x16x1xf32, #tpu.memory_space<vmem>>, vector<1x16x1xf32>,
    %c0_i32_27 = arith.constant 0 : i32
    %48 = vector.broadcast %c0_i32_27 : i32 to vector<16x64xi32>
    %49 = arith.cmpi sge, %10, %48 : vector<16x64xi32>
    %c16_i32 = arith.constant 16 : i32
    %50 = vector.broadcast %c16_i32 : i32 to vector<16x64xi32>
    %51 = arith.cmpi slt, %10, %50 : vector<16x64xi32>
    %52 = arith.andi %49, %51 : vector<16x64xi1>
    %cst_28 = arith.constant 0.000000e+00 : f32
    %53 = vector.broadcast %cst_28 : f32 to vector<16x64xf32>
    %54 = arith.select %52, %9, %53 : vector<16x64xi1>, vector<16x64xf32>
    %cst_29 = arith.constant dense<0.000000e+00> : vector<16x64xf32>
    %55 = tpu.matmul %35, %54, %cst_29 {dimension_numbers = #tpu.dot_dimension_numbers<[1], [0], [0], [1], [0, 0, 1, 1], [], []>} : vector<16x16xf32>, vector<16x64xf32>, vector<16x64xf32> -> vector<16x64xf32>
    %56 = arith.addf %13, %55 : vector<16x64xf32>
    %c0_i32_30 = arith.constant 0 : i32
    %57 = vector.broadcast %c0_i32_30 : i32 to vector<16x64xi32>
    %58 = arith.cmpi sge, %11, %57 : vector<16x64xi32>
    %c16_i32_31 = arith.constant 16 : i32
    %59 = vector.broadcast %c16_i32_31 : i32 to vector<16x64xi32>
    %60 = arith.cmpi slt, %11, %59 : vector<16x64xi32>
    %61 = arith.andi %58, %60 : vector<16x64xi1>
    %62 = vector.shape_cast %31 : vector<16x1xf32> to vector<16x1xf32>
    %63 = vector.broadcast %62 : vector<16x1xf32> to vector<16x64xf32>
    %64 = arith.select %61, %63, %12 : vector<16x64xi1>, vector<16x64xf32>
    %c0_32 = arith.constant 0 : index
    %c1 = arith.constant 1 : index
    %65 = vector.load %arg4[%c0_32, %c1] : memref<16x4xf32, #tpu.memory_space<vmem>>, vector<16x1xf32>
    %c1_33 = arith.constant 1 : index
    %c0_34 = arith.constant 0 : index
    %66 = vector.load %arg3[%c1_33, %c0_34] : memref<4x16xf32, #tpu.memory_space<vmem>>, vector<1x16xf32>
    %67 = vector.broadcast %65 : vector<16x1xf32> to vector<16x16xf32>
    %68 = vector.broadcast %66 : vector<1x16xf32> to vector<16x16xf32>
    %69 = arith.addf %67, %68 : vector<16x16xf32>
    %cst_35 = arith.constant 0.000000e+00 : f32
    %70 = vector.broadcast %cst_35 : f32 to vector<16x16xf32>
    %71 = arith.cmpf ogt, %69, %70 : vector<16x16xf32>
    %cst_36 = arith.constant 2.000000e-01 : f32
    %72 = vector.broadcast %cst_36 : f32 to vector<16x16xf32>
    %73 = arith.mulf %72, %69 : vector<16x16xf32>
    %74 = arith.select %71, %69, %73 : vector<16x16xi1>, vector<16x16xf32>
    %75 = arith.addf %74, %8 : vector<16x16xf32>
    %c1_37 = arith.constant 1 : index
    %c0_38 = arith.constant 0 : index
    %c0_39 = arith.constant 0 : index
    %76 = vector.load %arg7[%c1_37, %c0_38, %c0_39] : memref<4x16x1xf32, #tpu.memory_space<vmem>>, vector<1x16x1xf32>
    %77 = vector.shape_cast %76 : vector<1x16x1xf32> to vector<16x1xf32>
    %cst_40 = arith.constant dense<0xFF800000> : vector<16xf32>
    %78 = vector.multi_reduction <maximumf>, %75, %cst_40 [1] : vector<16x16xf32> to vector<16xf32>
    %79 = vector.shape_cast %78 : vector<16xf32> to vector<16x1xf32>
    %80 = arith.maximumf %77, %79 : vector<16x1xf32>
    %81 = arith.subf %77, %80 : vector<16x1xf32>
    %82 = math.exp %81 : vector<16x1xf32>
    %83 = vector.broadcast %80 : vector<16x1xf32> to vector<16x16xf32>
    %84 = arith.subf %75, %83 : vector<16x16xf32>
    %85 = math.exp %84 : vector<16x16xf32>
    %86 = arith.mulf %85, %4 : vector<16x16xf32>
    %c1_41 = arith.constant 1 : index
    %c0_42 = arith.constant 0 : index
    %c0_43 = arith.constant 0 : index
    %87 = vector.load %arg8[%c1_41, %c0_42, %c0_43] : memref<4x16x1xf32, #tpu.memory_space<vmem>>, vector<1x16x1xf32>
    %88 = vector.shape_cast %87 : vector<1x16x1xf32> to vector<16x1xf32>
    %89 = arith.mulf %82, %88 : vector<16x1xf32>
    %cst_44 = arith.constant dense<0.000000e+00> : vector<16xf32>
    %90 = vector.multi_reduction <add>, %86, %cst_44 [1] : vector<16x16xf32> to vector<16xf32>
    %91 = vector.shape_cast %90 : vector<16xf32> to vector<16x1xf32>
    %92 = arith.addf %89, %91 : vector<16x1xf32>
    %c1_45 = arith.constant 1 : index
    %c0_46 = arith.constant 0 : index
    %c0_47 = arith.constant 0 : index
    %93 = vector.load %arg8[%c1_45, %c0_46, %c0_47] : memref<4x16x1xf32, #tpu.memory_space<vmem>>, vector<1x16x1xf32>
    %94 = vector.shape_cast %93 : vector<1x16x1xf32> to vector<16x1xf32>
    %95 = vector.shape_cast %92 : vector<16x1xf32> to vector<1x16x1xf32>
    tpu.vector_store %arg8[%c1_45, %c0_46, %c0_47], %95 {strides = array<i32>} : memref<4x16x1xf32, #tpu.memory_space<vmem>>, vector<1x16x1xf32>,
    %c1_48 = arith.constant 1 : index
    %c0_49 = arith.constant 0 : index
    %c0_50 = arith.constant 0 : index
    %96 = vector.load %arg7[%c1_48, %c0_49, %c0_50] : memref<4x16x1xf32, #tpu.memory_space<vmem>>, vector<1x16x1xf32>
    %97 = vector.shape_cast %96 : vector<1x16x1xf32> to vector<16x1xf32>
    %98 = vector.shape_cast %80 : vector<16x1xf32> to vector<1x16x1xf32>
    tpu.vector_store %arg7[%c1_48, %c0_49, %c0_50], %98 {strides = array<i32>} : memref<4x16x1xf32, #tpu.memory_space<vmem>>, vector<1x16x1xf32>,
    %c16_i32_51 = arith.constant 16 : i32
    %99 = vector.broadcast %c16_i32_51 : i32 to vector<16x64xi32>
    %100 = arith.cmpi sge, %10, %99 : vector<16x64xi32>
    %c32_i32 = arith.constant 32 : i32
    %101 = vector.broadcast %c32_i32 : i32 to vector<16x64xi32>
    %102 = arith.cmpi slt, %10, %101 : vector<16x64xi32>
    %103 = arith.andi %100, %102 : vector<16x64xi1>
    %cst_52 = arith.constant 0.000000e+00 : f32
    %104 = vector.broadcast %cst_52 : f32 to vector<16x64xf32>
    %105 = arith.select %103, %9, %104 : vector<16x64xi1>, vector<16x64xf32>
    %cst_53 = arith.constant dense<0.000000e+00> : vector<16x64xf32>
    %106 = tpu.matmul %86, %105, %cst_53 {dimension_numbers = #tpu.dot_dimension_numbers<[1], [0], [0], [1], [0, 0, 1, 1], [], []>} : vector<16x16xf32>, vector<16x64xf32>, vector<16x64xf32> -> vector<16x64xf32>
    %107 = arith.addf %56, %106 : vector<16x64xf32>
    %c16_i32_54 = arith.constant 16 : i32
    %108 = vector.broadcast %c16_i32_54 : i32 to vector<16x64xi32>
    %109 = arith.cmpi sge, %11, %108 : vector<16x64xi32>
    %c32_i32_55 = arith.constant 32 : i32
    %110 = vector.broadcast %c32_i32_55 : i32 to vector<16x64xi32>
    %111 = arith.cmpi slt, %11, %110 : vector<16x64xi32>
    %112 = arith.andi %109, %111 : vector<16x64xi1>
    %113 = vector.shape_cast %82 : vector<16x1xf32> to vector<16x1xf32>
    %114 = vector.broadcast %113 : vector<16x1xf32> to vector<16x64xf32>
    %115 = arith.select %112, %114, %64 : vector<16x64xi1>, vector<16x64xf32>
    %c0_56 = arith.constant 0 : index
    %c2 = arith.constant 2 : index
    %116 = vector.load %arg4[%c0_56, %c2] : memref<16x4xf32, #tpu.memory_space<vmem>>, vector<16x1xf32>
    %c2_57 = arith.constant 2 : index
    %c0_58 = arith.constant 0 : index
    %117 = vector.load %arg3[%c2_57, %c0_58] : memref<4x16xf32, #tpu.memory_space<vmem>>, vector<1x16xf32>
    %118 = vector.broadcast %116 : vector<16x1xf32> to vector<16x16xf32>
    %119 = vector.broadcast %117 : vector<1x16xf32> to vector<16x16xf32>
    %120 = arith.addf %118, %119 : vector<16x16xf32>
    %cst_59 = arith.constant 0.000000e+00 : f32
    %121 = vector.broadcast %cst_59 : f32 to vector<16x16xf32>
    %122 = arith.cmpf ogt, %120, %121 : vector<16x16xf32>
    %cst_60 = arith.constant 2.000000e-01 : f32
    %123 = vector.broadcast %cst_60 : f32 to vector<16x16xf32>
    %124 = arith.mulf %123, %120 : vector<16x16xf32>
    %125 = arith.select %122, %120, %124 : vector<16x16xi1>, vector<16x16xf32>
    %126 = arith.addf %125, %8 : vector<16x16xf32>
    %c2_61 = arith.constant 2 : index
    %c0_62 = arith.constant 0 : index
    %c0_63 = arith.constant 0 : index
    %127 = vector.load %arg7[%c2_61, %c0_62, %c0_63] : memref<4x16x1xf32, #tpu.memory_space<vmem>>, vector<1x16x1xf32>
    %128 = vector.shape_cast %127 : vector<1x16x1xf32> to vector<16x1xf32>
    %cst_64 = arith.constant dense<0xFF800000> : vector<16xf32>
    %129 = vector.multi_reduction <maximumf>, %126, %cst_64 [1] : vector<16x16xf32> to vector<16xf32>
    %130 = vector.shape_cast %129 : vector<16xf32> to vector<16x1xf32>
    %131 = arith.maximumf %128, %130 : vector<16x1xf32>
    %132 = arith.subf %128, %131 : vector<16x1xf32>
    %133 = math.exp %132 : vector<16x1xf32>
    %134 = vector.broadcast %131 : vector<16x1xf32> to vector<16x16xf32>
    %135 = arith.subf %126, %134 : vector<16x16xf32>
    %136 = math.exp %135 : vector<16x16xf32>
    %137 = arith.mulf %136, %4 : vector<16x16xf32>
    %c2_65 = arith.constant 2 : index
    %c0_66 = arith.constant 0 : index
    %c0_67 = arith.constant 0 : index
    %138 = vector.load %arg8[%c2_65, %c0_66, %c0_67] : memref<4x16x1xf32, #tpu.memory_space<vmem>>, vector<1x16x1xf32>
    %139 = vector.shape_cast %138 : vector<1x16x1xf32> to vector<16x1xf32>
    %140 = arith.mulf %133, %139 : vector<16x1xf32>
    %cst_68 = arith.constant dense<0.000000e+00> : vector<16xf32>
    %141 = vector.multi_reduction <add>, %137, %cst_68 [1] : vector<16x16xf32> to vector<16xf32>
    %142 = vector.shape_cast %141 : vector<16xf32> to vector<16x1xf32>
    %143 = arith.addf %140, %142 : vector<16x1xf32>
    %c2_69 = arith.constant 2 : index
    %c0_70 = arith.constant 0 : index
    %c0_71 = arith.constant 0 : index
    %144 = vector.load %arg8[%c2_69, %c0_70, %c0_71] : memref<4x16x1xf32, #tpu.memory_space<vmem>>, vector<1x16x1xf32>
    %145 = vector.shape_cast %144 : vector<1x16x1xf32> to vector<16x1xf32>
    %146 = vector.shape_cast %143 : vector<16x1xf32> to vector<1x16x1xf32>
    tpu.vector_store %arg8[%c2_69, %c0_70, %c0_71], %146 {strides = array<i32>} : memref<4x16x1xf32, #tpu.memory_space<vmem>>, vector<1x16x1xf32>,
    %c2_72 = arith.constant 2 : index
    %c0_73 = arith.constant 0 : index
    %c0_74 = arith.constant 0 : index
    %147 = vector.load %arg7[%c2_72, %c0_73, %c0_74] : memref<4x16x1xf32, #tpu.memory_space<vmem>>, vector<1x16x1xf32>
    %148 = vector.shape_cast %147 : vector<1x16x1xf32> to vector<16x1xf32>
    %149 = vector.shape_cast %131 : vector<16x1xf32> to vector<1x16x1xf32>
    tpu.vector_store %arg7[%c2_72, %c0_73, %c0_74], %149 {strides = array<i32>} : memref<4x16x1xf32, #tpu.memory_space<vmem>>, vector<1x16x1xf32>,
    %c32_i32_75 = arith.constant 32 : i32
    %150 = vector.broadcast %c32_i32_75 : i32 to vector<16x64xi32>
    %151 = arith.cmpi sge, %10, %150 : vector<16x64xi32>
    %c48_i32 = arith.constant 48 : i32
    %152 = vector.broadcast %c48_i32 : i32 to vector<16x64xi32>
    %153 = arith.cmpi slt, %10, %152 : vector<16x64xi32>
    %154 = arith.andi %151, %153 : vector<16x64xi1>
    %cst_76 = arith.constant 0.000000e+00 : f32
    %155 = vector.broadcast %cst_76 : f32 to vector<16x64xf32>
    %156 = arith.select %154, %9, %155 : vector<16x64xi1>, vector<16x64xf32>
    %cst_77 = arith.constant dense<0.000000e+00> : vector<16x64xf32>
    %157 = tpu.matmul %137, %156, %cst_77 {dimension_numbers = #tpu.dot_dimension_numbers<[1], [0], [0], [1], [0, 0, 1, 1], [], []>} : vector<16x16xf32>, vector<16x64xf32>, vector<16x64xf32> -> vector<16x64xf32>
    %158 = arith.addf %107, %157 : vector<16x64xf32>
    %c32_i32_78 = arith.constant 32 : i32
    %159 = vector.broadcast %c32_i32_78 : i32 to vector<16x64xi32>
    %160 = arith.cmpi sge, %11, %159 : vector<16x64xi32>
    %c48_i32_79 = arith.constant 48 : i32
    %161 = vector.broadcast %c48_i32_79 : i32 to vector<16x64xi32>
    %162 = arith.cmpi slt, %11, %161 : vector<16x64xi32>
    %163 = arith.andi %160, %162 : vector<16x64xi1>
    %164 = vector.shape_cast %133 : vector<16x1xf32> to vector<16x1xf32>
    %165 = vector.broadcast %164 : vector<16x1xf32> to vector<16x64xf32>
    %166 = arith.select %163, %165, %115 : vector<16x64xi1>, vector<16x64xf32>
    %c0_80 = arith.constant 0 : index
    %c3 = arith.constant 3 : index
    %167 = vector.load %arg4[%c0_80, %c3] : memref<16x4xf32, #tpu.memory_space<vmem>>, vector<16x1xf32>
    %c3_81 = arith.constant 3 : index
    %c0_82 = arith.constant 0 : index
    %168 = vector.load %arg3[%c3_81, %c0_82] : memref<4x16xf32, #tpu.memory_space<vmem>>, vector<1x16xf32>
    %169 = vector.broadcast %167 : vector<16x1xf32> to vector<16x16xf32>
    %170 = vector.broadcast %168 : vector<1x16xf32> to vector<16x16xf32>
    %171 = arith.addf %169, %170 : vector<16x16xf32>
    %cst_83 = arith.constant 0.000000e+00 : f32
    %172 = vector.broadcast %cst_83 : f32 to vector<16x16xf32>
    %173 = arith.cmpf ogt, %171, %172 : vector<16x16xf32>
    %cst_84 = arith.constant 2.000000e-01 : f32
    %174 = vector.broadcast %cst_84 : f32 to vector<16x16xf32>
    %175 = arith.mulf %174, %171 : vector<16x16xf32>
    %176 = arith.select %173, %171, %175 : vector<16x16xi1>, vector<16x16xf32>
    %177 = arith.addf %176, %8 : vector<16x16xf32>
    %c3_85 = arith.constant 3 : index
    %c0_86 = arith.constant 0 : index
    %c0_87 = arith.constant 0 : index
    %178 = vector.load %arg7[%c3_85, %c0_86, %c0_87] : memref<4x16x1xf32, #tpu.memory_space<vmem>>, vector<1x16x1xf32>
    %179 = vector.shape_cast %178 : vector<1x16x1xf32> to vector<16x1xf32>
    %cst_88 = arith.constant dense<0xFF800000> : vector<16xf32>
    %180 = vector.multi_reduction <maximumf>, %177, %cst_88 [1] : vector<16x16xf32> to vector<16xf32>
    %181 = vector.shape_cast %180 : vector<16xf32> to vector<16x1xf32>
    %182 = arith.maximumf %179, %181 : vector<16x1xf32>
    %183 = arith.subf %179, %182 : vector<16x1xf32>
    %184 = math.exp %183 : vector<16x1xf32>
    %185 = vector.broadcast %182 : vector<16x1xf32> to vector<16x16xf32>
    %186 = arith.subf %177, %185 : vector<16x16xf32>
    %187 = math.exp %186 : vector<16x16xf32>
    %188 = arith.mulf %187, %4 : vector<16x16xf32>
    %c3_89 = arith.constant 3 : index
    %c0_90 = arith.constant 0 : index
    %c0_91 = arith.constant 0 : index
    %189 = vector.load %arg8[%c3_89, %c0_90, %c0_91] : memref<4x16x1xf32, #tpu.memory_space<vmem>>, vector<1x16x1xf32>
    %190 = vector.shape_cast %189 : vector<1x16x1xf32> to vector<16x1xf32>
    %191 = arith.mulf %184, %190 : vector<16x1xf32>
    %cst_92 = arith.constant dense<0.000000e+00> : vector<16xf32>
    %192 = vector.multi_reduction <add>, %188, %cst_92 [1] : vector<16x16xf32> to vector<16xf32>
    %193 = vector.shape_cast %192 : vector<16xf32> to vector<16x1xf32>
    %194 = arith.addf %191, %193 : vector<16x1xf32>
    %c3_93 = arith.constant 3 : index
    %c0_94 = arith.constant 0 : index
    %c0_95 = arith.constant 0 : index
    %195 = vector.load %arg8[%c3_93, %c0_94, %c0_95] : memref<4x16x1xf32, #tpu.memory_space<vmem>>, vector<1x16x1xf32>
    %196 = vector.shape_cast %195 : vector<1x16x1xf32> to vector<16x1xf32>
    %197 = vector.shape_cast %194 : vector<16x1xf32> to vector<1x16x1xf32>
    tpu.vector_store %arg8[%c3_93, %c0_94, %c0_95], %197 {strides = array<i32>} : memref<4x16x1xf32, #tpu.memory_space<vmem>>, vector<1x16x1xf32>,
    %c3_96 = arith.constant 3 : index
    %c0_97 = arith.constant 0 : index
    %c0_98 = arith.constant 0 : index
    %198 = vector.load %arg7[%c3_96, %c0_97, %c0_98] : memref<4x16x1xf32, #tpu.memory_space<vmem>>, vector<1x16x1xf32>
    %199 = vector.shape_cast %198 : vector<1x16x1xf32> to vector<16x1xf32>
    %200 = vector.shape_cast %182 : vector<16x1xf32> to vector<1x16x1xf32>
    tpu.vector_store %arg7[%c3_96, %c0_97, %c0_98], %200 {strides = array<i32>} : memref<4x16x1xf32, #tpu.memory_space<vmem>>, vector<1x16x1xf32>,
    %c48_i32_99 = arith.constant 48 : i32
    %201 = vector.broadcast %c48_i32_99 : i32 to vector<16x64xi32>
    %202 = arith.cmpi sge, %10, %201 : vector<16x64xi32>
    %c64_i32 = arith.constant 64 : i32
    %203 = vector.broadcast %c64_i32 : i32 to vector<16x64xi32>
    %204 = arith.cmpi slt, %10, %203 : vector<16x64xi32>
    %205 = arith.andi %202, %204 : vector<16x64xi1>
    %cst_100 = arith.constant 0.000000e+00 : f32
    %206 = vector.broadcast %cst_100 : f32 to vector<16x64xf32>
    %207 = arith.select %205, %9, %206 : vector<16x64xi1>, vector<16x64xf32>
    %cst_101 = arith.constant dense<0.000000e+00> : vector<16x64xf32>
    %208 = tpu.matmul %188, %207, %cst_101 {dimension_numbers = #tpu.dot_dimension_numbers<[1], [0], [0], [1], [0, 0, 1, 1], [], []>} : vector<16x16xf32>, vector<16x64xf32>, vector<16x64xf32> -> vector<16x64xf32>
    %209 = arith.addf %158, %208 : vector<16x64xf32>
    %c48_i32_102 = arith.constant 48 : i32
    %210 = vector.broadcast %c48_i32_102 : i32 to vector<16x64xi32>
    %211 = arith.cmpi sge, %11, %210 : vector<16x64xi32>
    %c64_i32_103 = arith.constant 64 : i32
    %212 = vector.broadcast %c64_i32_103 : i32 to vector<16x64xi32>
    %213 = arith.cmpi slt, %11, %212 : vector<16x64xi32>
    %214 = arith.andi %211, %213 : vector<16x64xi1>
    %215 = vector.shape_cast %184 : vector<16x1xf32> to vector<16x1xf32>
    %216 = vector.broadcast %215 : vector<16x1xf32> to vector<16x64xf32>
    %217 = arith.select %214, %216, %166 : vector<16x64xi1>, vector<16x64xf32>
    %c0_104 = arith.constant 0 : index
    %c0_105 = arith.constant 0 : index
    %218 = vector.load %arg9[%c0_104, %c0_105] : memref<16x64xf32, #tpu.memory_space<vmem>>, vector<16x64xf32>
    %219 = arith.mulf %217, %218 : vector<16x64xf32>
    %220 = arith.addf %219, %209 : vector<16x64xf32>
    %c0_106 = arith.constant 0 : index
    %c0_107 = arith.constant 0 : index
    %221 = vector.load %arg9[%c0_106, %c0_107] : memref<16x64xf32, #tpu.memory_space<vmem>>, vector<16x64xf32>
    tpu.vector_store %arg9[%c0_106, %c0_107], %220 {strides = array<i32>} : memref<16x64xf32, #tpu.memory_space<vmem>>, vector<16x64xf32>,
    %c0_i32_108 = arith.constant 0 : i32
    %222 = arith.cmpi eq, %arg1, %c0_i32_108 : i32
    %223 = arith.extui %222 : i1 to i32
    %c0_i32_109 = arith.constant 0 : i32
    %224 = arith.cmpi ne, %223, %c0_i32_109 : i32
    scf.if %224 {
      %cst_110 = arith.constant 0.000000e+00 : f32
      %225 = vector.broadcast %cst_110 : f32 to vector<16x64xf32>
      %c0_111 = arith.constant 0 : index
      %c0_112 = arith.constant 0 : index
      %c0_113 = arith.constant 0 : index
      %226 = vector.load %arg8[%c0_111, %c0_112, %c0_113] : memref<4x16x1xf32, #tpu.memory_space<vmem>>, vector<1x16x1xf32>
      %227 = vector.shape_cast %226 : vector<1x16x1xf32> to vector<16x1xf32>
      %cst_114 = arith.constant 9.99999935E-39 : f32
      %228 = vector.broadcast %cst_114 : f32 to vector<16x1xf32>
      %229 = arith.maximumf %227, %228 : vector<16x1xf32>
      %230 = tpu.reciprocal %229 {approx = true} : vector<16x1xf32> -> vector<16x1xf32>
      %231 = arith.mulf %229, %230 : vector<16x1xf32>
      %cst_115 = arith.constant 2.000000e+00 : f32
      %232 = vector.broadcast %cst_115 : f32 to vector<16x1xf32>
      %233 = arith.subf %232, %231 : vector<16x1xf32>
      %234 = arith.mulf %230, %233 : vector<16x1xf32>
      %c0_i32_116 = arith.constant 0 : i32
      %235 = vector.broadcast %c0_i32_116 : i32 to vector<16x64xi32>
      %236 = arith.cmpi sge, %11, %235 : vector<16x64xi32>
      %c16_i32_117 = arith.constant 16 : i32
      %237 = vector.broadcast %c16_i32_117 : i32 to vector<16x64xi32>
      %238 = arith.cmpi slt, %11, %237 : vector<16x64xi32>
      %239 = arith.andi %236, %238 : vector<16x64xi1>
      %240 = vector.shape_cast %234 : vector<16x1xf32> to vector<16x1xf32>
      %241 = vector.broadcast %240 : vector<16x1xf32> to vector<16x64xf32>
      %242 = arith.select %239, %241, %225 : vector<16x64xi1>, vector<16x64xf32>
      %c1_118 = arith.constant 1 : index
      %c0_119 = arith.constant 0 : index
      %c0_120 = arith.constant 0 : index
      %243 = vector.load %arg8[%c1_118, %c0_119, %c0_120] : memref<4x16x1xf32, #tpu.memory_space<vmem>>, vector<1x16x1xf32>
      %244 = vector.shape_cast %243 : vector<1x16x1xf32> to vector<16x1xf32>
      %cst_121 = arith.constant 9.99999935E-39 : f32
      %245 = vector.broadcast %cst_121 : f32 to vector<16x1xf32>
      %246 = arith.maximumf %244, %245 : vector<16x1xf32>
      %247 = tpu.reciprocal %246 {approx = true} : vector<16x1xf32> -> vector<16x1xf32>
      %248 = arith.mulf %246, %247 : vector<16x1xf32>
      %cst_122 = arith.constant 2.000000e+00 : f32
      %249 = vector.broadcast %cst_122 : f32 to vector<16x1xf32>
      %250 = arith.subf %249, %248 : vector<16x1xf32>
      %251 = arith.mulf %247, %250 : vector<16x1xf32>
      %c16_i32_123 = arith.constant 16 : i32
      %252 = vector.broadcast %c16_i32_123 : i32 to vector<16x64xi32>
      %253 = arith.cmpi sge, %11, %252 : vector<16x64xi32>
      %c32_i32_124 = arith.constant 32 : i32
      %254 = vector.broadcast %c32_i32_124 : i32 to vector<16x64xi32>
      %255 = arith.cmpi slt, %11, %254 : vector<16x64xi32>
      %256 = arith.andi %253, %255 : vector<16x64xi1>
      %257 = vector.shape_cast %251 : vector<16x1xf32> to vector<16x1xf32>
      %258 = vector.broadcast %257 : vector<16x1xf32> to vector<16x64xf32>
      %259 = arith.select %256, %258, %242 : vector<16x64xi1>, vector<16x64xf32>
      %c2_125 = arith.constant 2 : index
      %c0_126 = arith.constant 0 : index
      %c0_127 = arith.constant 0 : index
      %260 = vector.load %arg8[%c2_125, %c0_126, %c0_127] : memref<4x16x1xf32, #tpu.memory_space<vmem>>, vector<1x16x1xf32>
      %261 = vector.shape_cast %260 : vector<1x16x1xf32> to vector<16x1xf32>
      %cst_128 = arith.constant 9.99999935E-39 : f32
      %262 = vector.broadcast %cst_128 : f32 to vector<16x1xf32>
      %263 = arith.maximumf %261, %262 : vector<16x1xf32>
      %264 = tpu.reciprocal %263 {approx = true} : vector<16x1xf32> -> vector<16x1xf32>
      %265 = arith.mulf %263, %264 : vector<16x1xf32>
      %cst_129 = arith.constant 2.000000e+00 : f32
      %266 = vector.broadcast %cst_129 : f32 to vector<16x1xf32>
      %267 = arith.subf %266, %265 : vector<16x1xf32>
      %268 = arith.mulf %264, %267 : vector<16x1xf32>
      %c32_i32_130 = arith.constant 32 : i32
      %269 = vector.broadcast %c32_i32_130 : i32 to vector<16x64xi32>
      %270 = arith.cmpi sge, %11, %269 : vector<16x64xi32>
      %c48_i32_131 = arith.constant 48 : i32
      %271 = vector.broadcast %c48_i32_131 : i32 to vector<16x64xi32>
      %272 = arith.cmpi slt, %11, %271 : vector<16x64xi32>
      %273 = arith.andi %270, %272 : vector<16x64xi1>
      %274 = vector.shape_cast %268 : vector<16x1xf32> to vector<16x1xf32>
      %275 = vector.broadcast %274 : vector<16x1xf32> to vector<16x64xf32>
      %276 = arith.select %273, %275, %259 : vector<16x64xi1>, vector<16x64xf32>
      %c3_132 = arith.constant 3 : index
      %c0_133 = arith.constant 0 : index
      %c0_134 = arith.constant 0 : index
      %277 = vector.load %arg8[%c3_132, %c0_133, %c0_134] : memref<4x16x1xf32, #tpu.memory_space<vmem>>, vector<1x16x1xf32>
      %278 = vector.shape_cast %277 : vector<1x16x1xf32> to vector<16x1xf32>
      %cst_135 = arith.constant 9.99999935E-39 : f32
      %279 = vector.broadcast %cst_135 : f32 to vector<16x1xf32>
      %280 = arith.maximumf %278, %279 : vector<16x1xf32>
      %281 = tpu.reciprocal %280 {approx = true} : vector<16x1xf32> -> vector<16x1xf32>
      %282 = arith.mulf %280, %281 : vector<16x1xf32>
      %cst_136 = arith.constant 2.000000e+00 : f32
      %283 = vector.broadcast %cst_136 : f32 to vector<16x1xf32>
      %284 = arith.subf %283, %282 : vector<16x1xf32>
      %285 = arith.mulf %281, %284 : vector<16x1xf32>
      %c48_i32_137 = arith.constant 48 : i32
      %286 = vector.broadcast %c48_i32_137 : i32 to vector<16x64xi32>
      %287 = arith.cmpi sge, %11, %286 : vector<16x64xi32>
      %c64_i32_138 = arith.constant 64 : i32
      %288 = vector.broadcast %c64_i32_138 : i32 to vector<16x64xi32>
      %289 = arith.cmpi slt, %11, %288 : vector<16x64xi32>
      %290 = arith.andi %287, %289 : vector<16x64xi1>
      %291 = vector.shape_cast %285 : vector<16x1xf32> to vector<16x1xf32>
      %292 = vector.broadcast %291 : vector<16x1xf32> to vector<16x64xf32>
      %293 = arith.select %290, %292, %276 : vector<16x64xi1>, vector<16x64xf32>
      %c0_139 = arith.constant 0 : index
      %c0_140 = arith.constant 0 : index
      %294 = vector.load %arg9[%c0_139, %c0_140] : memref<16x64xf32, #tpu.memory_space<vmem>>, vector<16x64xf32>
      %295 = arith.mulf %294, %293 : vector<16x64xf32>
      %c0_141 = arith.constant 0 : index
      %c0_142 = arith.constant 0 : index
      %296 = vector.load %arg6[%c0_141, %c0_142] : memref<16x64xf32, #tpu.memory_space<vmem>>, vector<16x64xf32>
      tpu.vector_store %arg6[%c0_141, %c0_142], %295 {strides = array<i32>} : memref<16x64xf32, #tpu.memory_space<vmem>>, vector<16x64xf32>,
    } else {
    }
    return
  }
  func.func @transform_0(%arg0: i32, %arg1: i32) -> (i32, i32) {
    %c0_i32 = arith.constant 0 : i32
    %c0_i32_0 = arith.constant 0 : i32
    return %arg1, %c0_i32 : i32, i32
  }
  func.func @transform_1(%arg0: i32, %arg1: i32) -> (i32, i32) {
    %c0_i32 = arith.constant 0 : i32
    %c0_i32_0 = arith.constant 0 : i32
    return %c0_i32, %arg1 : i32, i32
  }
  func.func @transform_2(%arg0: i32, %arg1: i32) -> (i32, i32) {
    %c0_i32 = arith.constant 0 : i32
    %c0_i32_0 = arith.constant 0 : i32
    return %arg0, %c0_i32 : i32, i32
  }
  func.func @transform_3(%arg0: i32, %arg1: i32) -> (i32, i32) {
    %c0_i32 = arith.constant 0 : i32
    return %arg0, %arg1 : i32, i32
  }
  func.func @transform_4(%arg0: i32, %arg1: i32) -> (i32, i32) {
    %c0_i32 = arith.constant 0 : i32
    %c0_i32_0 = arith.constant 0 : i32
    return %arg0, %c0_i32 : i32, i32
  }
}

</mosaic_0001>

<bundles_post_ra>
// kernel: gat_conv.2
= control target key start
LH: loop header
LB: loop body
LE: loop exit
PB: predicated region body
PF: predicated region fallthrough
CT: control target
= control target key end

     0   :  { %vm17_vm0 = vcmask 261120   ;;  %s165_s1 = inlined_call_operand.vmem [shape: f32[32,128], index: 1, kind: input, shape index: {}]   ;;  %s166_s0 = inlined_call_operand.vmem [shape: f32[16,32], index: 0, kind: input, shape index: {}]   ;;  %s167_s2 = inlined_call_operand.vmem [shape: f32[16,128], index: 2, kind: output, shape index: {}]  }
   0x1   :  { %v16_v0 = vld [vmem:[%s165_s1 + $0x18] sm:$0xff]  ;;  %v15_v1 = vld [vmem:[%s165_s1 + $0x10] sm:$0xff]  ;;  %v11_v2 = vld [vmem:[%s166_s0] sm:$0xff] }
   0x2   :  { %113 = vmatprep.subr.mxu0 %v16_v0  ;;  %v14_v3 = vld [vmem:[%s165_s1 + $0x8] sm:$0xff]  ;;  %121 = vmatprep.mubr.msk.f32.mxu0 %vm17_vm0, %v11_v2  ;;  %v13_v4 = vld [vmem:[%s165_s1] sm:$0xff] }
   0x3   :  { %114 = vmatpush3.msra.mxu0 %v16_v0  ;;  %v12_v5 = vld [vmem:[%s166_s0 + $0x8] sm:$0xff] }
   0x4   :  { %115 = vmatprep.subr.mxu0 %v15_v1 }
   0x5   :  { %116 = vmatpush3.msra.mxu0 %v15_v1 }
   0x6   :  { %117 = vmatprep.subr.mxu0 %v14_v3 }
   0x7   :  { %118 = vmatpush3.msra.mxu0 %v14_v3 }
   0x8   :  { %119 = vmatprep.subr.mxu0 %v13_v4 }
   0x9   :  { %120 = vmatpush3.msra.mxu0 %v13_v4 }
   0xa   :  { %122 = vmatmul.mubr.msk.f32.vlgmr.msra.gmra.mxu0 %vm17_vm0, %v12_v5 }
  0xca   :  { %v123_v6 = vpop.f32.mrf.mxu0 }
  0xcb   :  { %100 = vst [vmem:[%s167_s2 + $0x8] sm:$0xff] %v123_v6 }
  0xcc   :  { %v90_v7 = vpop.f32.mrf.mxu0 }
  0xcd   :  { %99 = vst [vmem:[%s167_s2] sm:$0xff] %v90_v7 }

// kernel: gat_conv.3
= control target key start
LH: loop header
LB: loop body
LE: loop exit
PB: predicated region body
PF: predicated region fallthrough
CT: control target
= control target key end

     0   :  { %v1017_v0 = vmov 1   ;;  %v1018_v1 = vmov 0   ;;  %v1019_v4 = vmov 2   ;;  %v1020_v5 = vmov 3   ;;  %s1395_s2 = inlined_call_operand.vmem [shape: f32[16,4], index: 2, kind: input, shape index: {}]   ;;  %s1396_s3 = inlined_call_operand.vmem [shape: s8[16,16], index: 3, kind: input, shape index: {}]   ;;  %s1397_s1 = inlined_call_operand.vmem [shape: f32[4,16], index: 1, kind: input, shape index: {}]   ;;  %s1398_s0 = inlined_call_operand.vmem [shape: f32[16,64], index: 0, kind: input, shape index: {}]   ;;  %s1399_s4 = inlined_call_operand.vmem [shape: f32[16,64], index: 4, kind: output, shape index: {}]  }
   0x1   :  { %961 = vset.pattern.permute.xlu0 %v1017_v0  ;;  %962 = vset.pattern.permute.xlu1 %v1018_v1  ;;  %v151_v2 = vld [vmem:[%s1395_s2] sm:$0xff]  ;;  %v152_v3 = vld [vmem:[%s1395_s2 + $0x8] sm:$0xff]  ;;  %vm21_vm0 = vcmask 7168   ;;  %v1021_v6 = vmov -1e+30   ;;  %vm84_vm3 = vcmask 130048  }
   0x2   :  { %156 = vperm.xlu0 %961, %v151_v2   ;;  %60 = vperm.xlu1 %962, %v151_v2   ;;  %24 = vst.msk [vmem:[#allocation2 + $0x10] sm:$0xff] %vm21_vm0, %v1021_v6  ;;  %22 = vst.msk [vmem:[#allocation2] sm:$0xff] %vm21_vm0, %v1021_v6  ;;  %v908_v7 = vld [vmem:[%s1396_s3] sm:$0xf]  }
   0x3   :  { %23 = vst.msk [vmem:[#allocation2 + $0x8] sm:$0xff] %vm21_vm0, %v1021_v6  ;;  %25 = vst.msk [vmem:[#allocation2 + $0x18] sm:$0xff] %vm21_vm0, %v1021_v6  ;;  %v909_v8 = vunpack.c.0.s8 %v908_v7  ;;  %v910_v10 = vunpack.c.1.s8 %v908_v7  ;;  %v888_v11 = vld [vmem:[%s1397_s1 + $0x1] ss:$0 sm:$0xff]  ;;  %v887_v12 = vld [vmem:[%s1397_s1] ss:$0 sm:$0xff] }
   0x4   :  { %26 = vst.msk [vmem:[#allocation2 + $0x20] sm:$0xff] %vm21_vm0, %v1021_v6  ;;  %27 = vst.msk [vmem:[#allocation2 + $0x28] sm:$0xff] %vm21_vm0, %v1021_v6  ;;  %v897_v29 = vld [vmem:[%s1397_s1 + $0x2] ss:$0 sm:$0xff]  ;;  %v902_v45 = vld [vmem:[%s1397_s1 + $0x3] ss:$0 sm:$0xff] }
   0x5   :  { %28 = vst.msk [vmem:[#allocation2 + $0x30] sm:$0xff] %vm21_vm0, %v1021_v6  ;;  %29 = vst.msk [vmem:[#allocation2 + $0x38] sm:$0xff] %vm21_vm0, %v1021_v6  ;;  %v1065_v9 = vcvt.s32.f32 %v909_v8  ;;  %v1074_v14 = vcvt.s32.f32 %v910_v10 }
   0x6   :  { %161 = vperm.xlu0 %961, %v152_v3   ;;  %65 = vperm.xlu1 %962, %v152_v3  }
   0x7   :  { %v885_v13 = vadd.f32 -1.0, %v1065_v9  ;;  %v886_v20 = vadd.f32 -1.0, %v1074_v14 }
   0x9   :  { %v49_v19 = vmul.f32 1e+30, %v885_v13  ;;  %v50_v32 = vmul.f32 1e+30, %v886_v20  ;;  %v82_v6 = vld [vmem:[#allocation2] sm:$0xff] }
   0xa   :  { %963 = vset.pattern.permute.xlu0 %v1019_v4  ;;  %964 = vset.pattern.permute.xlu1 %v1019_v4  ;;  %v1022_v4 = vmov 0.0   ;;  %v1141_v13 = vld [vmem:[#allocation2 + $0x8] sm:$0xff] }
   0xb   :  { %414 = vperm.xlu0 %963, %v151_v2   ;;  %419 = vperm.xlu1 %964, %v152_v3   ;;  %30 = vst.msk [vmem:[#allocation3] sm:$0xff] %vm21_vm0, %v1022_v4  ;;  %31 = vst.msk [vmem:[#allocation3 + $0x8] sm:$0xff] %vm21_vm0, %v1022_v4 }
   0xc   :  { %32 = vst.msk [vmem:[#allocation3 + $0x10] sm:$0xff] %vm21_vm0, %v1022_v4  ;;  %33 = vst.msk [vmem:[#allocation3 + $0x18] sm:$0xff] %vm21_vm0, %v1022_v4 }
   0xd   :  { %34 = vst.msk [vmem:[#allocation3 + $0x20] sm:$0xff] %vm21_vm0, %v1022_v4  ;;  %35 = vst.msk [vmem:[#allocation3 + $0x28] sm:$0xff] %vm21_vm0, %v1022_v4 }
   0xe   :  { %36 = vst.msk [vmem:[#allocation3 + $0x30] sm:$0xff] %vm21_vm0, %v1022_v4  ;;  %37 = vst.msk [vmem:[#allocation3 + $0x38] sm:$0xff] %vm21_vm0, %v1022_v4 }
   0xf   :  { %965 = vset.pattern.permute.xlu1 %v1020_v5  ;;  %966 = vset.pattern.permute.xlu0 %v1020_v5  ;;  %v1131_v5 = vld [vmem:[#allocation2 + $0x10] sm:$0xff] }
  0x10   :  { %593 = vperm.xlu1 %965, %v151_v2   ;;  %598 = vperm.xlu0 %966, %v152_v3  }
  0x14   :  { %967 = vset.pattern.permute.xlu1 %v1018_v1  ;;  %968 = vset.pattern.permute.xlu0 %v1018_v1 }
  0x7d   :  { %v157_v15 = vpop.permute.xlu0 %156  ;;  %v61_v16 = vpop.permute.xlu1 %60 }
  0x7e   :  { %v168_v17 = vadd.f32 %v888_v11, %v157_v15  ;;  %v72_v18 = vadd.f32 %v887_v12, %v61_v16  ;;  %v1143_v15 = vld [vmem:[#allocation2 + $0x18] sm:$0xff] }
  0x80   :  { %vm170_vm1 = vcmp.gt.f32.partialorder %v168_v17, 0.0  ;;  %v172_v21 = vmul.f32 0.2, %v168_v17  ;;  %vm74_vm2 = vcmp.gt.f32.partialorder %v72_v18, 0.0  ;;  %v76_v22 = vmul.f32 0.2, %v72_v18 }
  0x81   :  { %v162_v23 = vpop.permute.xlu0 %161  ;;  %v66_v24 = vpop.permute.xlu1 %65 }
  0x82   :  { %v169_v25 = vadd.f32 %v888_v11, %v162_v23  ;;  %v73_v26 = vadd.f32 %v887_v12, %v66_v24  ;;  %v174_v27 = vsel %vm170_vm1, %v168_v17, %v172_v21  ;;  %v78_v28 = vsel %vm74_vm2, %v72_v18, %v76_v22  ;;  %v1161_v23 = vld [vmem:[#allocation2 + $0x28] sm:$0xff]  ;;  %v1163_v24 = vld [vmem:[#allocation2 + $0x20] sm:$0xff] }
  0x83   :  { %v1080_v30 = vadd.f32 %v174_v27, %v49_v19  ;;  %v1082_v31 = vadd.f32 %v78_v28, %v49_v19 }
  0x84   :  { %vm171_vm4 = vcmp.gt.f32.partialorder %v169_v25, 0.0  ;;  %v173_v33 = vmul.f32 0.2, %v169_v25  ;;  %vm75_vm5 = vcmp.gt.f32.partialorder %v73_v26, 0.0  ;;  %v77_v34 = vmul.f32 0.2, %v73_v26 }
  0x85   :  { %v181_v35 = vsel %vm84_vm3, %v1080_v30, -inf  ;;  %v85_v36 = vsel %vm84_vm3, %v1082_v31, -inf }
  0x86   :  { %v415_v37 = vpop.permute.xlu0 %414  ;;  %v420_v38 = vpop.permute.xlu1 %419  ;;  %182 = vmax.xlane.f32.xlu0 %v181_v35  ;;  %86 = vmax.xlane.f32.xlu1 %v85_v36  ;;  %v79_v39 = vsel %vm75_vm5, %v73_v26, %v77_v34  ;;  %v175_v40 = vsel %vm171_vm4, %v169_v25, %v173_v33  ;;  %v1174_v33 = vld [vmem:[#allocation2 + $0x38] sm:$0xff] }
  0x87   :  { %v426_v41 = vadd.f32 %v897_v29, %v415_v37  ;;  %v427_v42 = vadd.f32 %v897_v29, %v420_v38  ;;  %v1088_v43 = vadd.f32 %v79_v39, %v50_v32  ;;  %v1090_v44 = vadd.f32 %v175_v40, %v50_v32 }
  0x88   :  { %v53_v40 = vlaneseq }
  0x89   :  { %vm428_vm6 = vcmp.gt.f32.partialorder %v426_v41, 0.0  ;;  %v430_v46 = vmul.f32 0.2, %v426_v41  ;;  %vm429_vm7 = vcmp.gt.f32.partialorder %v427_v42, 0.0  ;;  %v431_v47 = vmul.f32 0.2, %v427_v42 }
  0x8a   :  { %v88_v48 = vsel %vm84_vm3, %v1088_v43, -inf  ;;  %v184_v49 = vsel %vm84_vm3, %v1090_v44, -inf }
  0x8b   :  { %89 = vmax.xlane.f32.xlu0 %v88_v48  ;;  %185 = vmax.xlane.f32.xlu1 %v184_v49  ;;  %v594_v50 = vpop.permute.xlu1 %593  ;;  %v599_v51 = vpop.permute.xlu0 %598  ;;  %v433_v52 = vsel %vm429_vm7, %v427_v42, %v431_v47  ;;  %v432_v53 = vsel %vm428_vm6, %v426_v41, %v430_v46  ;;  %v1206_v46 = vld [vmem:[%s1398_s0 + $0x8] sm:$0xff]  ;;  %v1218_v47 = vld [vmem:[%s1398_s0] sm:$0xff] }
  0x8c   :  { %v605_v54 = vadd.f32 %v902_v45, %v594_v50  ;;  %v606_v55 = vadd.f32 %v902_v45, %v599_v51  ;;  %v1099_v56 = vadd.f32 %v433_v52, %v50_v32  ;;  %v1101_v57 = vadd.f32 %v432_v53, %v49_v19 }
  0x8d   :  { %v1200_v45 = vand.u32 127, %v53_v40 }
  0x8e   :  { %vm607_vm8 = vcmp.gt.f32.partialorder %v605_v54, 0.0  ;;  %v609_v58 = vmul.f32 0.2, %v605_v54  ;;  %vm608_vm9 = vcmp.gt.f32.partialorder %v606_v55, 0.0  ;;  %v610_v59 = vmul.f32 0.2, %v606_v55 }
  0x8f   :  { %v442_v60 = vsel %vm84_vm3, %v1099_v56, -inf  ;;  %v439_v61 = vsel %vm84_vm3, %v1101_v57, -inf  ;;  %vm135_vm10 = vcmp.lt.s32.totalorder %v1200_v45, 16  ;;  %vm230_vm11 = vcmp.ge.s32.totalorder %v1200_v45, 16 }
  0x90   :  { %443 = vmax.xlane.f32.xlu0 %v442_v60  ;;  %440 = vmax.xlane.f32.xlu1 %v439_v61  ;;  %v611_v62 = vsel %vm607_vm8, %v605_v54, %v609_v58  ;;  %v612_v63 = vsel %vm608_vm9, %v606_v55, %v610_v59  ;;  %vm231_vm12 = vcmp.lt.s32.totalorder %v1200_v45, 32  ;;  %vm488_vm14 = vcmp.ge.s32.totalorder %v1200_v45, 32 }
  0x91   :  { %v1107_v0 = vadd.f32 %v611_v62, %v49_v19  ;;  %v1109_v1 = vadd.f32 %v612_v63, %v50_v32  ;;  %v1172_v32 = vld [vmem:[#allocation2 + $0x30] sm:$0xff]  ;;  %934 = vmatprep.subr.msk.mxu1 %vm135_vm10, %v1206_v46  ;;  %vm1229_vm13 = vmand %vm230_vm11, %vm231_vm12  ;;  %vm489_vm15 = vcmp.lt.s32.totalorder %v1200_v45, 48  ;;  %vm667_vm2 = vcmp.ge.s32.totalorder %v1200_v45, 48 }
  0x92   :  { %935 = vmatpush3.msk.msra.mxu1 %vm135_vm10, %v1206_v46  ;;  %927 = vmatprep.subr.msk.mxu0 %vm1229_vm13, %v1206_v46  ;;  %vm1250_vm1 = vmand %vm488_vm14, %vm489_vm15  ;;  %vm668_vm4 = vcmp.lt.s32.totalorder %v1200_v45, 64 }
  0x93   :  { %v618_v2 = vsel %vm84_vm3, %v1107_v0, -inf  ;;  %v621_v3 = vsel %vm84_vm3, %v1109_v1, -inf  ;;  %936 = vmatprep.subr.msk.mxu1 %vm135_vm10, %v1218_v47  ;;  %928 = vmatpush3.msk.msra.mxu0 %vm1229_vm13, %v1206_v46  ;;  %vm1259_vm5 = vmand %vm667_vm2, %vm668_vm4 }
  0x94   :  { %619 = vmax.xlane.f32.xlu1 %v618_v2  ;;  %622 = vmax.xlane.f32.xlu0 %v621_v3 }
  0x95   :  { %937 = vmatpush3.msk.msra.mxu1 %vm135_vm10, %v1218_v47  ;;  %929 = vmatprep.subr.msk.mxu0 %vm1229_vm13, %v1218_v47 }
  0x96   :  { %930 = vmatpush3.msk.msra.mxu0 %vm1229_vm13, %v1218_v47  ;;  %948 = vmatprep.subr.msk.mxu1 %vm1259_vm5, %v1206_v46 }
  0x97   :  { %941 = vmatprep.subr.msk.mxu0 %vm1250_vm1, %v1206_v46 }
 0x10f   :  { %v183_v7 = vpop.xlane.xlu0 %182  ;;  %v87_v8 = vpop.xlane.xlu1 %86 }
 0x110   :  { %v1134_v10 = vmax.f32 %v1131_v5, %v183_v7  ;;  %v91_v11 = vmax.f32 %v82_v6, %v87_v8 }
 0x112   :  { %v189_v12 = vsub.f32 %v1131_v5, %v1134_v10  ;;  %228 = vst.msk [vmem:[#allocation2 + $0x10] sm:$0xff] %vm21_vm0, %v1134_v10  ;;  %132 = vst.msk [vmem:[#allocation2] sm:$0xff] %vm21_vm0, %v91_v11  ;;  %101 = vperm.xlu1 %967, %v91_v11   ;;  %v93_v16 = vsub.f32 %v82_v6, %v91_v11 }
 0x114   :  { %v90_v17 = vpop.xlane.xlu0 %89  ;;  %v186_v18 = vpop.xlane.xlu1 %185  ;;  %v95_v25 = vmul.f32 1.442695, %v93_v16 }
 0x115   :  { %v1146_v19 = vmax.f32 %v1141_v13, %v90_v17  ;;  %v1149_v20 = vmax.f32 %v1143_v15, %v186_v18 }
 0x116   :  { %197 = vperm.xlu1 %967, %v1134_v10   ;;  %969 = vpow2.f32 %v95_v25 }
 0x117   :  { %v94_v21 = vsub.f32 %v1141_v13, %v1146_v19  ;;  %133 = vst.msk [vmem:[#allocation2 + $0x8] sm:$0xff] %vm21_vm0, %v1146_v19  ;;  %v190_v22 = vsub.f32 %v1143_v15, %v1149_v20  ;;  %229 = vst.msk [vmem:[#allocation2 + $0x18] sm:$0xff] %vm21_vm0, %v1149_v20  ;;  %106 = vperm.xlu0 %968, %v1146_v19  }
 0x119   :  { %v444_v26 = vpop.xlane.xlu0 %443  ;;  %v441_v27 = vpop.xlane.xlu1 %440  ;;  %v193_v19 = vmul.f32 1.442695, %v190_v22 }
 0x11a   :  { %v1166_v28 = vmax.f32 %v1161_v23, %v444_v26  ;;  %v1169_v29 = vmax.f32 %v1163_v24, %v441_v27  ;;  %202 = vperm.xlu1 %967, %v1149_v20  }
 0x11c   :  { %v448_v34 = vsub.f32 %v1161_v23, %v1166_v28  ;;  %487 = vst.msk [vmem:[#allocation2 + $0x28] sm:$0xff] %vm21_vm0, %v1166_v28  ;;  %v447_v35 = vsub.f32 %v1163_v24, %v1169_v29  ;;  %486 = vst.msk [vmem:[#allocation2 + $0x20] sm:$0xff] %vm21_vm0, %v1169_v29  ;;  %455 = vperm.xlu0 %968, %v1169_v29   ;;  %v117_v29 = vld [vmem:[#allocation3] sm:$0xff] }
 0x11d   :  { %v620_v36 = vpop.xlane.xlu1 %619  ;;  %v623_v37 = vpop.xlane.xlu0 %622 }
 0x11e   :  { %v1186_v38 = vmax.f32 %v1172_v32, %v620_v36  ;;  %460 = vperm.xlu1 %967, %v1166_v28   ;;  %v1190_v39 = vmax.f32 %v1174_v33, %v623_v37  ;;  %v449_v13 = vmul.f32 1.442695, %v447_v35  ;;  %v451_v5 = vmul.f32 1.442695, %v448_v34  ;;  %v214_v34 = vld [vmem:[#allocation3 + $0x10] sm:$0xff] }
 0x120   :  { %v626_v41 = vsub.f32 %v1172_v32, %v1186_v38  ;;  %665 = vst.msk [vmem:[#allocation2 + $0x30] sm:$0xff] %vm21_vm0, %v1186_v38  ;;  %v627_v42 = vsub.f32 %v1174_v33, %v1190_v39  ;;  %666 = vst.msk [vmem:[#allocation2 + $0x38] sm:$0xff] %vm21_vm0, %v1190_v39 }
 0x122   :  { %634 = vperm.xlu1 %967, %v1186_v38   ;;  %v118_v38 = vld [vmem:[#allocation3 + $0x8] sm:$0xff] }
 0x123   :  { %v1236_v49 = vpop.eup %969 }
 0x124   :  { %v119_v32 = vmul.f32 %v1236_v49, %v117_v29 }
 0x126   :  { %639 = vperm.xlu1 %967, %v1190_v39  }
 0x12a   :  { %141 = vperm.xlu1 %967, %v1236_v49  }
 0x18d   :  { %v102_v52 = vpop.permute.xlu1 %101 }
 0x18e   :  { %v109_v53 = vsub.f32 %v1082_v31, %v102_v52 }
 0x190   :  { %v111_v54 = vmul.f32 1.442695, %v109_v53 }
 0x191   :  { %v198_v55 = vpop.permute.xlu1 %197 }
 0x192   :  { %971 = vpow2.f32 %v111_v54  ;;  %v107_v58 = vpop.permute.xlu0 %106  ;;  %v205_v59 = vsub.f32 %v1080_v30, %v198_v55 }
 0x193   :  { %v110_v60 = vsub.f32 %v1088_v43, %v107_v58 }
 0x194   :  { %v207_v61 = vmul.f32 1.442695, %v205_v59 }
 0x195   :  { %v113_v62 = vmul.f32 1.442695, %v110_v60  ;;  %v203_v63 = vpop.permute.xlu1 %202 }
 0x196   :  { %973 = vpow2.f32 %v207_v61  ;;  %v206_v2 = vsub.f32 %v1090_v44, %v203_v63 }
 0x197   :  { %975 = vpow2.f32 %v113_v62  ;;  %v456_v3 = vpop.permute.xlu0 %455 }
 0x198   :  { %v209_v6 = vmul.f32 1.442695, %v206_v2  ;;  %v463_v7 = vsub.f32 %v1101_v57, %v456_v3  ;;  %v97_v2 = vmul.f32 1.442695, %v94_v21 }
 0x199   :  { %v461_v31 = vpop.permute.xlu1 %460 }
 0x19a   :  { %977 = vpow2.f32 %v209_v6  ;;  %v465_v8 = vmul.f32 1.442695, %v463_v7  ;;  %v464_v11 = vsub.f32 %v1099_v56, %v461_v31  ;;  %v191_v7 = vmul.f32 1.442695, %v189_v12 }
 0x19b   :  { %v630_v12 = vmul.f32 1.442695, %v627_v42 }
 0x19c   :  { %979 = vpow2.f32 %v465_v8  ;;  %v467_v30 = vmul.f32 1.442695, %v464_v11  ;;  %v215_v8 = vld [vmem:[#allocation3 + $0x18] sm:$0xff] }
 0x19d   :  { %v635_v16 = vpop.permute.xlu1 %634 }
 0x19e   :  { %981 = vpow2.f32 %v467_v30  ;;  %v642_v43 = vsub.f32 %v1107_v0, %v635_v16  ;;  %v472_v30 = vld [vmem:[#allocation3 + $0x20] sm:$0xff] }
 0x19f   :  { %v972_v17 = vpop.eup %971 }
 0x1a0   :  { %v644_v18 = vmul.f32 1.442695, %v642_v43  ;;  %v115_v44 = vmul.f32 %v972_v17, %v1065_v9  ;;  %v473_v17 = vld [vmem:[#allocation3 + $0x28] sm:$0xff] }
 0x1a1   :  { %v640_v25 = vpop.permute.xlu1 %639 }
 0x1a2   :  { %983 = vpow2.f32 %v644_v18  ;;  %v643_v26 = vsub.f32 %v1109_v1, %v640_v25  ;;  %938 = vmatprep.mubr.msk.f32.mxu1 %vm84_vm3, %v115_v44  ;;  %v121_v57 = vsel %vm84_vm3, %v115_v44, 0.0 }
 0x1a3   :  { %v974_v27 = vpop.eup %973  ;;  %122 = vadd.xlane.f32.xlu1 %v121_v57 }
 0x1a4   :  { %v976_v56 = vpop.eup %975  ;;  %v646_v36 = vmul.f32 1.442695, %v643_v26  ;;  %v211_v37 = vmul.f32 %v974_v27, %v1065_v9 }
 0x1a5   :  { %v116_v0 = vmul.f32 %v976_v56, %v1074_v14  ;;  %v1341_v28 = vpop.permute.xlu1 %141  ;;  %v651_v56 = vld [vmem:[#allocation3 + $0x30] sm:$0xff] }
 0x1a6   :  { %985 = vpow2.f32 %v646_v36  ;;  %931 = vmatprep.mubr.msk.f32.mxu0 %vm84_vm3, %v211_v37  ;;  %v218_v40 = vsel %vm84_vm3, %v211_v37, 0.0 }
 0x1a7   :  { %v978_v52 = vpop.eup %977  ;;  %939 = vmatmul.mubr.msk.f32.vlgmr.msra.gmra.mxu1 %vm84_vm3, %v116_v0  ;;  %v124_v1 = vsel %vm84_vm3, %v116_v0, 0.0  ;;  %219 = vadd.xlane.f32.xlu1 %v218_v40  ;;  %987 = vpow2.f32 %v97_v2 }
 0x1a8   :  { %125 = vadd.xlane.f32.xlu0 %v124_v1  ;;  %v212_v53 = vmul.f32 %v978_v52, %v1074_v14  ;;  %949 = vmatpush3.msk.msra.mxu1 %vm1259_vm5, %v1206_v46  ;;  %989 = vpow2.f32 %v191_v7 }
 0x1a9   :  { %v980_v54 = vpop.eup %979  ;;  %950 = vmatprep.subr.msk.mxu1 %vm1259_vm5, %v1218_v47  ;;  %991 = vpow2.f32 %v449_v13 }
 0x1aa   :  { %932 = vmatmul.mubr.msk.f32.vlgmr.msra.gmra.mxu0 %vm84_vm3, %v212_v53  ;;  %v221_v55 = vsel %vm84_vm3, %v212_v53, 0.0  ;;  %v469_v58 = vmul.f32 %v980_v54, %v1065_v9  ;;  %951 = vmatpush3.msk.msra.mxu1 %vm1259_vm5, %v1218_v47  ;;  %993 = vpow2.f32 %v193_v19  ;;  %v652_v54 = vld [vmem:[#allocation3 + $0x38] sm:$0xff] }
 0x1ab   :  { %v982_v59 = vpop.eup %981  ;;  %942 = vmatpush3.msk.msra.mxu0 %vm1250_vm1, %v1206_v46 }
 0x1ac   :  { %222 = vadd.xlane.f32.xlu0 %v221_v55  ;;  %945 = vmatprep.mubr.msk.f32.mxu0 %vm84_vm3, %v469_v58  ;;  %v476_v60 = vsel %vm84_vm3, %v469_v58, 0.0  ;;  %v470_v61 = vmul.f32 %v982_v59, %v1074_v14 }
 0x1ad   :  { %477 = vadd.xlane.f32.xlu1 %v476_v60  ;;  %943 = vmatprep.subr.msk.mxu0 %vm1250_vm1, %v1218_v47 }
 0x1ae   :  { %944 = vmatpush3.msk.msra.mxu0 %vm1250_vm1, %v1218_v47  ;;  %v479_v62 = vsel %vm84_vm3, %v470_v61, 0.0 }
 0x1af   :  { %v984_v63 = vpop.eup %983  ;;  %946 = vmatmul.mubr.msk.f32.vlgmr.msra.gmra.mxu0 %vm84_vm3, %v470_v61 }
 0x1b0   :  { %480 = vadd.xlane.f32.xlu0 %v479_v62  ;;  %v648_v46 = vmul.f32 %v984_v63, %v1065_v9 }
 0x1b2   :  { %952 = vmatprep.mubr.msk.f32.mxu1 %vm84_vm3, %v648_v46  ;;  %v655_v3 = vsel %vm84_vm3, %v648_v46, 0.0 }
 0x1b3   :  { %v986_v6 = vpop.eup %985  ;;  %656 = vadd.xlane.f32.xlu1 %v655_v3 }
 0x1b4   :  { %v649_v47 = vmul.f32 %v986_v6, %v1074_v14  ;;  %v628_v14 = vmul.f32 1.442695, %v626_v41  ;;  %v988_v10 = vpop.eup %987 }
 0x1b5   :  { %v990_v15 = vpop.eup %989  ;;  %v120_v39 = vmul.f32 %v988_v10, %v118_v38 }
 0x1b6   :  { %953 = vmatmul.mubr.msk.f32.vlgmr.msra.gmra.mxu1 %vm84_vm3, %v649_v47  ;;  %v658_v9 = vsel %vm84_vm3, %v649_v47, 0.0  ;;  %995 = vpow2.f32 %v628_v14  ;;  %vm38_vm3 = vcmask 523264   ;;  %v992_v20 = vpop.eup %991 }
 0x1b7   :  { %659 = vadd.xlane.f32.xlu0 %v658_v9  ;;  %997 = vpow2.f32 %v451_v5  ;;  %39 = vst.msk [vmem:[#allocation4] sm:$0xff] %vm38_vm3, %v1022_v4  ;;  %40 = vst.msk [vmem:[#allocation4 + $0x8] sm:$0xff] %vm38_vm3, %v1022_v4  ;;  %v994_v21 = vpop.eup %993  ;;  %v216_v4 = vmul.f32 %v990_v15, %v214_v34  ;;  %v474_v43 = vmul.f32 %v992_v20, %v472_v30 }
 0x1b8   :  { %999 = vpow2.f32 %v630_v12  ;;  %v217_v16 = vmul.f32 %v994_v21, %v215_v8 }
 0x1c3   :  { %v996_v22 = vpop.eup %995 }
 0x1c4   :  { %146 = vperm.xlu1 %967, %v988_v10   ;;  %v998_v23 = vpop.eup %997  ;;  %v653_v40 = vmul.f32 %v996_v22, %v651_v56 }
 0x1c5   :  { %v1000_v24 = vpop.eup %999  ;;  %v475_v27 = vmul.f32 %v998_v23, %v473_v17 }
 0x1c6   :  { %v654_v59 = vmul.f32 %v1000_v24, %v652_v54 }
 0x1c8   :  { %399 = vperm.xlu1 %967, %v990_v15  }
 0x1cc   :  { %578 = vperm.xlu1 %967, %v992_v20  }
 0x1cd   :  { %404 = vperm.xlu0 %968, %v994_v21  }
 0x1d0   :  { %757 = vperm.xlu1 %967, %v996_v22  }
 0x1d1   :  { %583 = vperm.xlu0 %968, %v998_v23  }
 0x1d5   :  { %762 = vperm.xlu0 %968, %v1000_v24  }
 0x22c   :  { %v123_v33 = vpop.xlane.xlu1 %122 }
 0x22d   :  { %v127_v35 = vadd.f32 %v123_v33, %v119_v32 }
 0x22f   :  { %130 = vst.msk [vmem:[#allocation3] sm:$0xff] %vm21_vm0, %v127_v35 }
 0x230   :  { %v220_v41 = vpop.xlane.xlu1 %219 }
 0x231   :  { %v126_v42 = vpop.xlane.xlu0 %125  ;;  %v224_v31 = vadd.f32 %v220_v41, %v216_v4 }
 0x232   :  { %v128_v11 = vadd.f32 %v126_v42, %v120_v39 }
 0x233   :  { %226 = vst.msk [vmem:[#allocation3 + $0x10] sm:$0xff] %vm21_vm0, %v224_v31 }
 0x234   :  { %131 = vst.msk [vmem:[#allocation3 + $0x8] sm:$0xff] %vm21_vm0, %v128_v11 }
 0x235   :  { %v223_v49 = vpop.xlane.xlu0 %222 }
 0x236   :  { %v225_v18 = vadd.f32 %v223_v49, %v217_v16  ;;  %v478_v44 = vpop.xlane.xlu1 %477  ;;  %v779_v25 = vld [vmem:[#allocation3] sm:$0xff] }
 0x237   :  { %v482_v26 = vadd.f32 %v478_v44, %v474_v43  ;;  %v781_v57 = vmax.f32 %v779_v25, 1e-38 }
 0x238   :  { %227 = vst.msk [vmem:[#allocation3 + $0x18] sm:$0xff] %vm21_vm0, %v225_v18 }
 0x239   :  { %484 = vst.msk [vmem:[#allocation3 + $0x20] sm:$0xff] %vm21_vm0, %v482_v26  ;;  %v481_v36 = vpop.xlane.xlu0 %480  ;;  %1001 = vrcp.f32 %v781_v57 }
 0x23a   :  { %v483_v37 = vadd.f32 %v481_v36, %v475_v27  ;;  %v803_v0 = vld [vmem:[#allocation3 + $0x10] sm:$0xff] }
 0x23b   :  { %v780_v52 = vld [vmem:[#allocation3 + $0x8] sm:$0xff]  ;;  %v805_v1 = vmax.f32 %v803_v0, 1e-38 }
 0x23c   :  { %485 = vst.msk [vmem:[#allocation3 + $0x28] sm:$0xff] %vm21_vm0, %v483_v37  ;;  %v657_v53 = vpop.xlane.xlu1 %656  ;;  %v782_v55 = vmax.f32 %v780_v52, 1e-38 }
 0x23d   :  { %v661_v58 = vadd.f32 %v657_v53, %v653_v40  ;;  %1003 = vrcp.f32 %v805_v1 }
 0x23e   :  { %1005 = vrcp.f32 %v782_v55 }
 0x23f   :  { %663 = vst.msk [vmem:[#allocation3 + $0x30] sm:$0xff] %vm21_vm0, %v661_v58  ;;  %v804_v60 = vld [vmem:[#allocation3 + $0x18] sm:$0xff] }
 0x240   :  { %v660_v61 = vpop.xlane.xlu0 %659  ;;  %v806_v62 = vmax.f32 %v804_v60, 1e-38  ;;  %v827_v63 = vld [vmem:[#allocation3 + $0x20] sm:$0xff]  ;;  %v147_v26 = vpop.permute.xlu1 %146 }
 0x241   :  { %v662_v46 = vadd.f32 %v660_v61, %v654_v59  ;;  %v829_v2 = vmax.f32 %v827_v63, 1e-38 }
 0x242   :  { %1007 = vrcp.f32 %v806_v62 }
 0x243   :  { %664 = vst.msk [vmem:[#allocation3 + $0x38] sm:$0xff] %vm21_vm0, %v662_v46  ;;  %1009 = vrcp.f32 %v829_v2  ;;  %v828_v3 = vld [vmem:[#allocation3 + $0x28] sm:$0xff] }
 0x244   :  { %v830_v6 = vmax.f32 %v828_v3, 1e-38  ;;  %v400_v27 = vpop.permute.xlu1 %399 }
 0x246   :  { %v1002_v47 = vpop.eup %1001  ;;  %1011 = vrcp.f32 %v830_v6  ;;  %v851_v7 = vld [vmem:[#allocation3 + $0x30] sm:$0xff] }
 0x247   :  { %v785_v9 = vmul.f32 %v1002_v47, %v781_v57  ;;  %v853_v13 = vmax.f32 %v851_v7, 1e-38 }
 0x248   :  { %v405_v57 = vpop.permute.xlu0 %404  ;;  %v579_v0 = vpop.permute.xlu1 %578 }
 0x249   :  { %v787_v19 = vsub.f32 2.0, %v785_v9  ;;  %1013 = vrcp.f32 %v853_v13 }
 0x24a   :  { %v1004_v14 = vpop.eup %1003  ;;  %v852_v5 = vld [vmem:[#allocation3 + $0x38] sm:$0xff] }
 0x24b   :  { %v1006_v10 = vpop.eup %1005  ;;  %v789_v12 = vmul.f32 %v1002_v47, %v787_v19  ;;  %v809_v15 = vmul.f32 %v1004_v14, %v805_v1  ;;  %v854_v20 = vmax.f32 %v852_v5, 1e-38  ;;  %v150_v1 = vsel %vm135_vm10, %v147_v26, 1.0 }
 0x24c   :  { %v786_v21 = vmul.f32 %v1006_v10, %v782_v55  ;;  %v584_v36 = vpop.permute.xlu0 %583  ;;  %v408_v54 = vsel %vm1229_vm13, %v405_v57, %v150_v1  ;;  %v149_v55 = vsel %vm135_vm10, %v1341_v28, 1.0  ;;  %v758_v59 = vpop.permute.xlu1 %757  ;;  %v767_v28 = vld [vmem:[#allocation4] sm:$0xff] }
 0x24d   :  { %793 = vperm.xlu1 %967, %v789_v12   ;;  %v811_v22 = vsub.f32 2.0, %v809_v15  ;;  %1015 = vrcp.f32 %v854_v20  ;;  %v587_v58 = vsel %vm1250_vm1, %v584_v36, %v408_v54  ;;  %v407_v61 = vsel %vm1229_vm13, %v400_v27, %v149_v55 }
 0x24e   :  { %v788_v23 = vsub.f32 2.0, %v786_v21  ;;  %v586_v3 = vsel %vm1250_vm1, %v579_v0, %v407_v61 }
 0x24f   :  { %v1008_v24 = vpop.eup %1007  ;;  %v813_v29 = vmul.f32 %v1004_v14, %v811_v22  ;;  %v765_v7 = vsel %vm1259_vm5, %v758_v59, %v586_v3 }
 0x250   :  { %v1010_v32 = vpop.eup %1009  ;;  %v790_v33 = vmul.f32 %v1006_v10, %v788_v23  ;;  %v810_v34 = vmul.f32 %v1008_v24, %v806_v62  ;;  %v763_v53 = vpop.permute.xlu0 %762  ;;  %v768_v62 = vld [vmem:[#allocation4 + $0x8] sm:$0xff]  ;;  %v769_v10 = vmul.f32 %v767_v28, %v765_v7 }
 0x251   :  { %817 = vperm.xlu0 %968, %v813_v29   ;;  %v833_v35 = vmul.f32 %v1010_v32, %v829_v2  ;;  %v766_v63 = vsel %vm1259_vm5, %v763_v53, %v587_v58 }
 0x252   :  { %798 = vperm.xlu1 %967, %v790_v33   ;;  %v812_v38 = vsub.f32 2.0, %v810_v34 }
 0x253   :  { %v1012_v4 = vpop.eup %1011  ;;  %v835_v39 = vsub.f32 2.0, %v833_v35 }
 0x254   :  { %v814_v41 = vmul.f32 %v1008_v24, %v812_v38  ;;  %v834_v42 = vmul.f32 %v1012_v4, %v830_v6 }
 0x255   :  { %v837_v31 = vmul.f32 %v1010_v32, %v835_v39 }
 0x256   :  { %v1014_v8 = vpop.eup %1013  ;;  %822 = vperm.xlu1 %967, %v814_v41   ;;  %v836_v11 = vsub.f32 2.0, %v834_v42 }
 0x257   :  { %841 = vperm.xlu0 %968, %v837_v31   ;;  %v857_v30 = vmul.f32 %v1014_v8, %v853_v13  ;;  %v770_v13 = vmul.f32 %v768_v62, %v766_v63 }
 0x258   :  { %v838_v16 = vmul.f32 %v1012_v4, %v836_v11 }
 0x259   :  { %v859_v49 = vsub.f32 2.0, %v857_v30 }
 0x25a   :  { %v1016_v43 = vpop.eup %1015  ;;  %846 = vperm.xlu1 %967, %v838_v16  }
 0x25b   :  { %v861_v17 = vmul.f32 %v1014_v8, %v859_v49  ;;  %v858_v18 = vmul.f32 %v1016_v43, %v854_v20 }
 0x25d   :  { %865 = vperm.xlu0 %968, %v861_v17   ;;  %v860_v44 = vsub.f32 2.0, %v858_v18 }
 0x25f   :  { %v862_v25 = vmul.f32 %v1016_v43, %v860_v44 }
 0x261   :  { %870 = vperm.xlu1 %967, %v862_v25  }
 0x267   :  { %v940_v40 = vpop.f32.mrf.mxu1 }
 0x269   :  { %v388_v46 = vpop.f32.mrf.mxu1 }
 0x26a   :  { %v933_v56 = vpop.f32.mrf.mxu0 }
 0x26b   :  { %v394_v60 = vadd.f32 %v940_v40, %v933_v56 }
 0x26c   :  { %v307_v37 = vpop.f32.mrf.mxu0 }
 0x26d   :  { %v389_v6 = vadd.f32 %v388_v46, %v307_v37 }
 0x26f   :  { %v947_v52 = vpop.f32.mrf.mxu0 }
 0x270   :  { %v575_v47 = vadd.f32 %v947_v52, %v394_v60 }
 0x271   :  { %v565_v2 = vpop.f32.mrf.mxu0 }
 0x272   :  { %v574_v19 = vadd.f32 %v565_v2, %v389_v6 }
 0x276   :  { %v954_v9 = vpop.f32.mrf.mxu1 }
 0x277   :  { %v754_v14 = vadd.f32 %v954_v9, %v575_v47 }
 0x278   :  { %v744_v5 = vpop.f32.mrf.mxu1 }
 0x279   :  { %v772_v12 = vadd.f32 %v770_v13, %v754_v14  ;;  %v753_v15 = vadd.f32 %v744_v5, %v574_v19 }
 0x27b   :  { %775 = vst.msk [vmem:[#allocation4 + $0x8] sm:$0xff] %vm38_vm3, %v772_v12  ;;  %v771_v20 = vadd.f32 %v769_v10, %v753_v15 }
 0x27d   :  { %774 = vst.msk [vmem:[#allocation4] sm:$0xff] %vm38_vm3, %v771_v20 }
 0x282   :  { %v876_v16 = vld [vmem:[#allocation4 + $0x8] sm:$0xff] }
 0x284   :  { %v875_v39 = vld [vmem:[#allocation4] sm:$0xff] }
 0x2c8   :  { %v794_v21 = vpop.permute.xlu1 %793 }
 0x2c9   :  { %v801_v32 = vsel %vm135_vm10, %v794_v21, 0.0 }
 0x2cc   :  { %v818_v23 = vpop.permute.xlu0 %817 }
 0x2cd   :  { %v799_v22 = vpop.permute.xlu1 %798  ;;  %v825_v33 = vsel %vm1229_vm13, %v818_v23, %v801_v32 }
 0x2ce   :  { %v802_v41 = vsel %vm135_vm10, %v799_v22, 0.0 }
 0x2d1   :  { %v823_v24 = vpop.permute.xlu1 %822 }
 0x2d2   :  { %v842_v29 = vpop.permute.xlu0 %841  ;;  %v826_v31 = vsel %vm1229_vm13, %v823_v24, %v802_v41 }
 0x2d3   :  { %v849_v34 = vsel %vm1250_vm1, %v842_v29, %v825_v33 }
 0x2d5   :  { %v847_v35 = vpop.permute.xlu1 %846 }
 0x2d6   :  { %v850_v8 = vsel %vm1250_vm1, %v847_v35, %v826_v31 }
 0x2d8   :  { %v866_v38 = vpop.permute.xlu0 %865 }
 0x2d9   :  { %v873_v4 = vsel %vm1259_vm5, %v866_v38, %v849_v34 }
 0x2da   :  { %v877_v42 = vmul.f32 %v875_v39, %v873_v4 }
 0x2dc   :  { %879 = vst.msk [vmem:[%s1399_s4] sm:$0xff] %vm38_vm3, %v877_v42  ;;  %v871_v11 = vpop.permute.xlu1 %870 }
 0x2dd   :  { %v874_v30 = vsel %vm1259_vm5, %v871_v11, %v850_v8 }
 0x2de   :  { %v878_v49 = vmul.f32 %v876_v16, %v874_v30 }
 0x2e0   :  { %880 = vst.msk [vmem:[%s1399_s4 + $0x8] sm:$0xff] %vm38_vm3, %v878_v49 }

</bundles_post_ra>
